<compile_context>
chip_gen: v5e
topology: v5e:2x2
jax: 0.10.0
libtpu: 0.0.40
codegen_flags: <defaults>
</compile_context>

<pallas_src>
import jax
import jax.numpy as jnp
from jax import lax
from jax.experimental import pallas as pl
from jax.experimental.pallas import tpu as pltpu  # noqa: F401  (kept for parity)


# ----------------------------------------------------------------------------
# Fused Pallas kernel: all LSTM layers + last-timestep extraction.
# ----------------------------------------------------------------------------
def _encoder_kernel(x_ref, wih0_ref, wih_rest_ref, whh_ref, b_ref, out_ref):
    # x_ref:        (B, T, D)        VMEM, batch_first input (no wrapper transpose)
    # wih0_ref:     (D, 4H)          layer-0 input weights, cols ordered (i,f,o,g)
    # wih_rest_ref: (max(L-1,1), H, 4H)  input weights of layers >= 1 (dummy if L==1)
    # whh_ref:      (L, H, 4H)       recurrent weights
    # b_ref:        (L, 1, 4H)       combined b_ih + b_hh per layer
    # out_ref:      (B, H)           last-timestep hidden state of last layer
    B, T, D = x_ref.shape
    L = whh_ref.shape[0]
    H = whh_ref.shape[1]

    def cell(gates, c_prev, first_step):
        # gates columns are (i, f, o, g): one sigmoid over 3H lanes, one tanh over H.
        sig = jax.nn.sigmoid(gates[:, : 3 * H])
        g_g = jnp.tanh(gates[:, 3 * H:])
        i_g = sig[:, :H]
        f_g = sig[:, H: 2 * H]
        o_g = sig[:, 2 * H: 3 * H]
        if first_step:            # c0 == 0 -> f * c0 vanishes
            c_new = i_g * g_g
        else:
            c_new = f_g * c_prev + i_g * g_g
        h_new = o_g * jnp.tanh(c_new)
        return h_new, c_new

    # ---- Layer 0: hoisted input projection over all timesteps at once. ----
    x2d = x_ref[...].reshape(B * T, D)                                   # b-major rows
    proj0 = (jnp.dot(x2d, wih0_ref[...], preferred_element_type=jnp.float32)
             + b_ref[0])                                                 # (B*T, 4H)
    proj0 = proj0.reshape(B, T, 4 * H)
    layer_in = [proj0[:, t, :] for t in range(T)]                        # T x (B, 4H)

    h = None
    hs = []
    for l in range(L):
        if l > 0:
            # Hoisted input projection for layer l from previous layer's hiddens.
            h_all = jnp.concatenate(hs, axis=0)                          # (T*B, H), t-major
            proj = (jnp.dot(h_all, wih_rest_ref[l - 1],
                            preferred_element_type=jnp.float32)
                    + b_ref[l])                                          # (T*B, 4H)
            layer_in = [proj[t * B:(t + 1) * B, :] for t in range(T)]

        whh = whh_ref[l]                                                 # (H, 4H)

        # Time loop: fully unrolled (T static), t = 0 peeled (h0 = c0 = 0).
        hs = []
        h, c = cell(layer_in[0], None, True)
        hs.append(h)
        for t in range(1, T):
            gates = layer_in[t] + jnp.dot(h, whh,
                                          preferred_element_type=jnp.float32)
            h, c = cell(gates, c, False)
            hs.append(h)

    out_ref[...] = h.astype(out_ref.dtype)


# ----------------------------------------------------------------------------
# One-time parameter preparation (outside the per-forward path).
# ----------------------------------------------------------------------------
def prepare_kernel_params(params, hidden_size):
    """PyTorch-layout params -> kernel layout.

    params: list of (w_ih (4H, D_in), w_hh (4H, H), b (4H,)) per layer, with
    PyTorch gate order (i, f, g, o) and b = b_ih + b_hh.
    Returns (wih0 (D,4H), wih_rest (max(L-1,1),H,4H), whh_all (L,H,4H),
    b_all (L,1,4H)) with gate columns reordered to (i, f, o, g).
    """
    H = hidden_size
    perm = jnp.concatenate([
        jnp.arange(0, 2 * H),        # i, f
        jnp.arange(3 * H, 4 * H),    # o
        jnp.arange(2 * H, 3 * H),    # g
    ])
    wih_list, whh_list, b_list = [], [], []
    for (w_ih, w_hh, b) in params:
        wih_list.append(jnp.transpose(w_ih[perm, :]).astype(jnp.float32))  # (D_in, 4H)
        whh_list.append(jnp.transpose(w_hh[perm, :]).astype(jnp.float32))  # (H, 4H)
        b_list.append(b[perm][None, :].astype(jnp.float32))                # (1, 4H)

    wih0 = wih_list[0]
    if len(wih_list) > 1:
        wih_rest = jnp.stack(wih_list[1:], axis=0)                         # (L-1, H, 4H)
    else:
        wih_rest = jnp.zeros((1, H, 4 * H), jnp.float32)                   # never read
    whh_all = jnp.stack(whh_list, axis=0)                                  # (L, H, 4H)
    b_all = jnp.stack(b_list, axis=0)                                      # (L, 1, 4H)
    return wih0, wih_rest, whh_all, b_all


# ----------------------------------------------------------------------------
# Encoder wrapper: one fused pallas_call, no intermediate HBM traffic.
# ----------------------------------------------------------------------------
def encoder_forward(x_btd, kernel_params):
    """x_btd: (B, T, input_size) -> (B, 1, hidden_size)."""
    wih0, wih_rest, whh_all, b_all = kernel_params
    B, T, D = x_btd.shape
    H = whh_all.shape[1]

    out = pl.pallas_call(
        _encoder_kernel,
        out_shape=jax.ShapeDtypeStruct((B, H), jnp.float32),
        in_specs=[
            pl.BlockSpec((B, T, D), lambda: (0, 0, 0)),
            pl.BlockSpec(wih0.shape, lambda: (0, 0)),
            pl.BlockSpec(wih_rest.shape, lambda: (0, 0, 0)),
            pl.BlockSpec(whh_all.shape, lambda: (0, 0, 0)),
            pl.BlockSpec(b_all.shape, lambda: (0, 0, 0)),
        ],
        out_specs=pl.BlockSpec((B, H), lambda: (0, 0)),
    )(x_btd.astype(jnp.float32), wih0, wih_rest, whh_all, b_all)

    return out[:, None, :]       # (B, 1, H)


# ----------------------------------------------------------------------------
# Parameter init matching nn.LSTM shapes / the module's custom init.
# ----------------------------------------------------------------------------
def init_encoder_params(key, input_size, hidden_size, num_layers):
    """Layer-0 weights: orthogonal (gain 1.4) as in the PyTorch module;
    other layers / biases: uniform(-1/sqrt(H), 1/sqrt(H)) (PyTorch default).
    Bias stored combined as b_ih + b_hh. Gate order is PyTorch's (i, f, g, o)."""
    orth = jax.nn.initializers.orthogonal(scale=1.4)
    k = 1.0 / jnp.sqrt(hidden_size)
    params = []
    for layer in range(num_layers):
        d_in = input_size if layer == 0 else hidden_size
        key, k1, k2, k3, k4 = jax.random.split(key, 5)
        if layer == 0:
            w_ih = orth(k1, (4 * hidden_size, d_in), jnp.float32)
            w_hh = orth(k2, (4 * hidden_size, hidden_size), jnp.float32)
        else:
            w_ih = jax.random.uniform(k1, (4 * hidden_size, d_in), jnp.float32, -k, k)
            w_hh = jax.random.uniform(k2, (4 * hidden_size, hidden_size), jnp.float32, -k, k)
        b_ih = jax.random.uniform(k3, (4 * hidden_size,), jnp.float32, -k, k)
        b_hh = jax.random.uniform(k4, (4 * hidden_size,), jnp.float32, -k, k)
        params.append((w_ih, w_hh, b_ih + b_hh))
    return params


# ----------------------------------------------------------------------------
# Pure-JAX reference (lax.scan, original PyTorch gate order) — guards the
# gate-column permutation and the fused-kernel math.
# ----------------------------------------------------------------------------
def encoder_reference(x_btd, params):
    x = jnp.transpose(x_btd, (1, 0, 2)).astype(jnp.float32)  # (T, B, D)
    B = x.shape[1]
    for (w_ih, w_hh, b) in params:
        H = w_hh.shape[1]

        def cell(carry, x_t):
            h, c = carry
            gates = x_t @ w_ih.T + h @ w_hh.T + b
            i_g = jax.nn.sigmoid(gates[:, 0 * H:1 * H])
            f_g = jax.nn.sigmoid(gates[:, 1 * H:2 * H])
            g_g = jnp.tanh(gates[:, 2 * H:3 * H])
            o_g = jax.nn.sigmoid(gates[:, 3 * H:4 * H])
            c_new = f_g * c + i_g * g_g
            h_new = o_g * jnp.tanh(c_new)
            return (h_new, c_new), h_new

        init = (jnp.zeros((B, H), jnp.float32), jnp.zeros((B, H), jnp.float32))
        _, x = lax.scan(cell, init, x)
    return x[-1][:, None, :]


if __name__ == "__main__":
    B, T, INPUT_SIZE, HIDDEN_SIZE, NUM_LAYERS = 2, 8, 16, 32, 2

    key = jax.random.PRNGKey(0)
    key, xkey = jax.random.split(key)
    x = jax.random.normal(xkey, (B, T, INPUT_SIZE), dtype=jnp.float32)

    params = init_encoder_params(key, INPUT_SIZE, HIDDEN_SIZE, NUM_LAYERS)
    kparams = prepare_kernel_params(params, HIDDEN_SIZE)   # one-time weight prep

    fwd = jax.jit(encoder_forward)
    out = jax.block_until_ready(fwd(x, kparams))
    assert out.shape == (B, 1, HIDDEN_SIZE), out.shape

    ref = jax.block_until_ready(encoder_reference(x, params))
    assert jnp.allclose(out, ref, rtol=2e-3, atol=2e-3), (
        float(jnp.max(jnp.abs(out - ref)))
    )

    print("KERNEL_OK")
</pallas_src>

<mosaic_0001>
module attributes {stable_mosaic.version = 11 : i64} {
  func.func @_encoder_kernel(%arg0: memref<2x8x16xf32, #tpu.memory_space<vmem>>, %arg1: memref<16x128xf32, #tpu.memory_space<vmem>>, %arg2: memref<1x32x128xf32, #tpu.memory_space<vmem>>, %arg3: memref<2x32x128xf32, #tpu.memory_space<vmem>>, %arg4: memref<2x1x128xf32, #tpu.memory_space<vmem>>, %arg5: memref<2x32xf32, #tpu.memory_space<vmem>>) attributes {dimension_semantics = [], scalar_prefetch = 0 : i64, scratch_operands = 0 : i64, tpu.core_type = #tpu.core_type<tc>} {
    %c0 = arith.constant 0 : index
    %c0_0 = arith.constant 0 : index
    %c0_1 = arith.constant 0 : index
    %0 = vector.load %arg0[%c0, %c0_0, %c0_1] : memref<2x8x16xf32, #tpu.memory_space<vmem>>, vector<2x8x16xf32>
    %1 = vector.shape_cast %0 : vector<2x8x16xf32> to vector<16x16xf32>
    %c0_2 = arith.constant 0 : index
    %c0_3 = arith.constant 0 : index
    %2 = vector.load %arg1[%c0_2, %c0_3] : memref<16x128xf32, #tpu.memory_space<vmem>>, vector<16x128xf32>
    %cst = arith.constant dense<0.000000e+00> : vector<16x128xf32>
    %3 = tpu.matmul %1, %2, %cst {dimension_numbers = #tpu.dot_dimension_numbers<[1], [0], [0], [1], [0, 0, 1, 1], [], []>} : vector<16x16xf32>, vector<16x128xf32>, vector<16x128xf32> -> vector<16x128xf32>
    %c0_4 = arith.constant 0 : index
    %c0_5 = arith.constant 0 : index
    %c0_6 = arith.constant 0 : index
    %4 = vector.load %arg4[%c0_4, %c0_5, %c0_6] : memref<2x1x128xf32, #tpu.memory_space<vmem>>, vector<1x1x128xf32>
    %5 = vector.shape_cast %4 : vector<1x1x128xf32> to vector<1x128xf32>
    %6 = vector.broadcast %5 : vector<1x128xf32> to vector<16x128xf32>
    %7 = arith.addf %3, %6 : vector<16x128xf32>
    %8 = vector.shape_cast %7 : vector<16x128xf32> to vector<2x8x128xf32>
    %9 = vector.extract_strided_slice %8 {offsets = [0, 0, 0], sizes = [2, 1, 128], strides = [1, 1, 1]} : vector<2x8x128xf32> to vector<2x1x128xf32>
    %10 = vector.shape_cast %9 : vector<2x1x128xf32> to vector<2x128xf32>
    %11 = vector.extract_strided_slice %8 {offsets = [0, 1, 0], sizes = [2, 1, 128], strides = [1, 1, 1]} : vector<2x8x128xf32> to vector<2x1x128xf32>
    %12 = vector.shape_cast %11 : vector<2x1x128xf32> to vector<2x128xf32>
    %13 = vector.extract_strided_slice %8 {offsets = [0, 2, 0], sizes = [2, 1, 128], strides = [1, 1, 1]} : vector<2x8x128xf32> to vector<2x1x128xf32>
    %14 = vector.shape_cast %13 : vector<2x1x128xf32> to vector<2x128xf32>
    %15 = vector.extract_strided_slice %8 {offsets = [0, 3, 0], sizes = [2, 1, 128], strides = [1, 1, 1]} : vector<2x8x128xf32> to vector<2x1x128xf32>
    %16 = vector.shape_cast %15 : vector<2x1x128xf32> to vector<2x128xf32>
    %17 = vector.extract_strided_slice %8 {offsets = [0, 4, 0], sizes = [2, 1, 128], strides = [1, 1, 1]} : vector<2x8x128xf32> to vector<2x1x128xf32>
    %18 = vector.shape_cast %17 : vector<2x1x128xf32> to vector<2x128xf32>
    %19 = vector.extract_strided_slice %8 {offsets = [0, 5, 0], sizes = [2, 1, 128], strides = [1, 1, 1]} : vector<2x8x128xf32> to vector<2x1x128xf32>
    %20 = vector.shape_cast %19 : vector<2x1x128xf32> to vector<2x128xf32>
    %21 = vector.extract_strided_slice %8 {offsets = [0, 6, 0], sizes = [2, 1, 128], strides = [1, 1, 1]} : vector<2x8x128xf32> to vector<2x1x128xf32>
    %22 = vector.shape_cast %21 : vector<2x1x128xf32> to vector<2x128xf32>
    %23 = vector.extract_strided_slice %8 {offsets = [0, 7, 0], sizes = [2, 1, 128], strides = [1, 1, 1]} : vector<2x8x128xf32> to vector<2x1x128xf32>
    %24 = vector.shape_cast %23 : vector<2x1x128xf32> to vector<2x128xf32>
    %c0_7 = arith.constant 0 : index
    %c0_8 = arith.constant 0 : index
    %c0_9 = arith.constant 0 : index
    %25 = vector.load %arg3[%c0_7, %c0_8, %c0_9] : memref<2x32x128xf32, #tpu.memory_space<vmem>>, vector<1x32x128xf32>
    %26 = vector.shape_cast %25 : vector<1x32x128xf32> to vector<32x128xf32>
    %27 = vector.extract_strided_slice %10 {offsets = [0, 0], sizes = [2, 96], strides = [1, 1]} : vector<2x128xf32> to vector<2x96xf32>
    %28 = arith.negf %27 : vector<2x96xf32>
    %29 = math.exp %28 : vector<2x96xf32>
    %cst_10 = arith.constant 1.000000e+00 : f32
    %30 = vector.broadcast %cst_10 : f32 to vector<2x96xf32>
    %31 = arith.addf %30, %29 : vector<2x96xf32>
    %32 = arith.divf %30, %31 : vector<2x96xf32>
    %33 = vector.extract_strided_slice %10 {offsets = [0, 96], sizes = [2, 32], strides = [1, 1]} : vector<2x128xf32> to vector<2x32xf32>
    %34 = math.tanh %33 : vector<2x32xf32>
    %35 = vector.extract_strided_slice %32 {offsets = [0, 0], sizes = [2, 32], strides = [1, 1]} : vector<2x96xf32> to vector<2x32xf32>
    %36 = vector.extract_strided_slice %32 {offsets = [0, 64], sizes = [2, 32], strides = [1, 1]} : vector<2x96xf32> to vector<2x32xf32>
    %37 = arith.mulf %35, %34 : vector<2x32xf32>
    %38 = math.tanh %37 : vector<2x32xf32>
    %39 = arith.mulf %36, %38 : vector<2x32xf32>
    %cst_11 = arith.constant dense<0.000000e+00> : vector<2x128xf32>
    %40 = tpu.matmul %39, %26, %cst_11 {dimension_numbers = #tpu.dot_dimension_numbers<[1], [0], [0], [1], [0, 0, 1, 1], [], []>} : vector<2x32xf32>, vector<32x128xf32>, vector<2x128xf32> -> vector<2x128xf32>
    %41 = arith.addf %12, %40 : vector<2x128xf32>
    %42 = vector.extract_strided_slice %41 {offsets = [0, 0], sizes = [2, 96], strides = [1, 1]} : vector<2x128xf32> to vector<2x96xf32>
    %43 = arith.negf %42 : vector<2x96xf32>
    %44 = math.exp %43 : vector<2x96xf32>
    %cst_12 = arith.constant 1.000000e+00 : f32
    %45 = vector.broadcast %cst_12 : f32 to vector<2x96xf32>
    %46 = arith.addf %45, %44 : vector<2x96xf32>
    %47 = arith.divf %45, %46 : vector<2x96xf32>
    %48 = vector.extract_strided_slice %41 {offsets = [0, 96], sizes = [2, 32], strides = [1, 1]} : vector<2x128xf32> to vector<2x32xf32>
    %49 = math.tanh %48 : vector<2x32xf32>
    %50 = vector.extract_strided_slice %47 {offsets = [0, 0], sizes = [2, 32], strides = [1, 1]} : vector<2x96xf32> to vector<2x32xf32>
    %51 = vector.extract_strided_slice %47 {offsets = [0, 32], sizes = [2, 32], strides = [1, 1]} : vector<2x96xf32> to vector<2x32xf32>
    %52 = vector.extract_strided_slice %47 {offsets = [0, 64], sizes = [2, 32], strides = [1, 1]} : vector<2x96xf32> to vector<2x32xf32>
    %53 = arith.mulf %51, %37 : vector<2x32xf32>
    %54 = arith.mulf %50, %49 : vector<2x32xf32>
    %55 = arith.addf %53, %54 : vector<2x32xf32>
    %56 = math.tanh %55 : vector<2x32xf32>
    %57 = arith.mulf %52, %56 : vector<2x32xf32>
    %cst_13 = arith.constant dense<0.000000e+00> : vector<2x128xf32>
    %58 = tpu.matmul %57, %26, %cst_13 {dimension_numbers = #tpu.dot_dimension_numbers<[1], [0], [0], [1], [0, 0, 1, 1], [], []>} : vector<2x32xf32>, vector<32x128xf32>, vector<2x128xf32> -> vector<2x128xf32>
    %59 = arith.addf %14, %58 : vector<2x128xf32>
    %60 = vector.extract_strided_slice %59 {offsets = [0, 0], sizes = [2, 96], strides = [1, 1]} : vector<2x128xf32> to vector<2x96xf32>
    %61 = arith.negf %60 : vector<2x96xf32>
    %62 = math.exp %61 : vector<2x96xf32>
    %cst_14 = arith.constant 1.000000e+00 : f32
    %63 = vector.broadcast %cst_14 : f32 to vector<2x96xf32>
    %64 = arith.addf %63, %62 : vector<2x96xf32>
    %65 = arith.divf %63, %64 : vector<2x96xf32>
    %66 = vector.extract_strided_slice %59 {offsets = [0, 96], sizes = [2, 32], strides = [1, 1]} : vector<2x128xf32> to vector<2x32xf32>
    %67 = math.tanh %66 : vector<2x32xf32>
    %68 = vector.extract_strided_slice %65 {offsets = [0, 0], sizes = [2, 32], strides = [1, 1]} : vector<2x96xf32> to vector<2x32xf32>
    %69 = vector.extract_strided_slice %65 {offsets = [0, 32], sizes = [2, 32], strides = [1, 1]} : vector<2x96xf32> to vector<2x32xf32>
    %70 = vector.extract_strided_slice %65 {offsets = [0, 64], sizes = [2, 32], strides = [1, 1]} : vector<2x96xf32> to vector<2x32xf32>
    %71 = arith.mulf %69, %55 : vector<2x32xf32>
    %72 = arith.mulf %68, %67 : vector<2x32xf32>
    %73 = arith.addf %71, %72 : vector<2x32xf32>
    %74 = math.tanh %73 : vector<2x32xf32>
    %75 = arith.mulf %70, %74 : vector<2x32xf32>
    %cst_15 = arith.constant dense<0.000000e+00> : vector<2x128xf32>
    %76 = tpu.matmul %75, %26, %cst_15 {dimension_numbers = #tpu.dot_dimension_numbers<[1], [0], [0], [1], [0, 0, 1, 1], [], []>} : vector<2x32xf32>, vector<32x128xf32>, vector<2x128xf32> -> vector<2x128xf32>
    %77 = arith.addf %16, %76 : vector<2x128xf32>
    %78 = vector.extract_strided_slice %77 {offsets = [0, 0], sizes = [2, 96], strides = [1, 1]} : vector<2x128xf32> to vector<2x96xf32>
    %79 = arith.negf %78 : vector<2x96xf32>
    %80 = math.exp %79 : vector<2x96xf32>
    %cst_16 = arith.constant 1.000000e+00 : f32
    %81 = vector.broadcast %cst_16 : f32 to vector<2x96xf32>
    %82 = arith.addf %81, %80 : vector<2x96xf32>
    %83 = arith.divf %81, %82 : vector<2x96xf32>
    %84 = vector.extract_strided_slice %77 {offsets = [0, 96], sizes = [2, 32], strides = [1, 1]} : vector<2x128xf32> to vector<2x32xf32>
    %85 = math.tanh %84 : vector<2x32xf32>
    %86 = vector.extract_strided_slice %83 {offsets = [0, 0], sizes = [2, 32], strides = [1, 1]} : vector<2x96xf32> to vector<2x32xf32>
    %87 = vector.extract_strided_slice %83 {offsets = [0, 32], sizes = [2, 32], strides = [1, 1]} : vector<2x96xf32> to vector<2x32xf32>
    %88 = vector.extract_strided_slice %83 {offsets = [0, 64], sizes = [2, 32], strides = [1, 1]} : vector<2x96xf32> to vector<2x32xf32>
    %89 = arith.mulf %87, %73 : vector<2x32xf32>
    %90 = arith.mulf %86, %85 : vector<2x32xf32>
    %91 = arith.addf %89, %90 : vector<2x32xf32>
    %92 = math.tanh %91 : vector<2x32xf32>
    %93 = arith.mulf %88, %92 : vector<2x32xf32>
    %cst_17 = arith.constant dense<0.000000e+00> : vector<2x128xf32>
    %94 = tpu.matmul %93, %26, %cst_17 {dimension_numbers = #tpu.dot_dimension_numbers<[1], [0], [0], [1], [0, 0, 1, 1], [], []>} : vector<2x32xf32>, vector<32x128xf32>, vector<2x128xf32> -> vector<2x128xf32>
    %95 = arith.addf %18, %94 : vector<2x128xf32>
    %96 = vector.extract_strided_slice %95 {offsets = [0, 0], sizes = [2, 96], strides = [1, 1]} : vector<2x128xf32> to vector<2x96xf32>
    %97 = arith.negf %96 : vector<2x96xf32>
    %98 = math.exp %97 : vector<2x96xf32>
    %cst_18 = arith.constant 1.000000e+00 : f32
    %99 = vector.broadcast %cst_18 : f32 to vector<2x96xf32>
    %100 = arith.addf %99, %98 : vector<2x96xf32>
    %101 = arith.divf %99, %100 : vector<2x96xf32>
    %102 = vector.extract_strided_slice %95 {offsets = [0, 96], sizes = [2, 32], strides = [1, 1]} : vector<2x128xf32> to vector<2x32xf32>
    %103 = math.tanh %102 : vector<2x32xf32>
    %104 = vector.extract_strided_slice %101 {offsets = [0, 0], sizes = [2, 32], strides = [1, 1]} : vector<2x96xf32> to vector<2x32xf32>
    %105 = vector.extract_strided_slice %101 {offsets = [0, 32], sizes = [2, 32], strides = [1, 1]} : vector<2x96xf32> to vector<2x32xf32>
    %106 = vector.extract_strided_slice %101 {offsets = [0, 64], sizes = [2, 32], strides = [1, 1]} : vector<2x96xf32> to vector<2x32xf32>
    %107 = arith.mulf %105, %91 : vector<2x32xf32>
    %108 = arith.mulf %104, %103 : vector<2x32xf32>
    %109 = arith.addf %107, %108 : vector<2x32xf32>
    %110 = math.tanh %109 : vector<2x32xf32>
    %111 = arith.mulf %106, %110 : vector<2x32xf32>
    %cst_19 = arith.constant dense<0.000000e+00> : vector<2x128xf32>
    %112 = tpu.matmul %111, %26, %cst_19 {dimension_numbers = #tpu.dot_dimension_numbers<[1], [0], [0], [1], [0, 0, 1, 1], [], []>} : vector<2x32xf32>, vector<32x128xf32>, vector<2x128xf32> -> vector<2x128xf32>
    %113 = arith.addf %20, %112 : vector<2x128xf32>
    %114 = vector.extract_strided_slice %113 {offsets = [0, 0], sizes = [2, 96], strides = [1, 1]} : vector<2x128xf32> to vector<2x96xf32>
    %115 = arith.negf %114 : vector<2x96xf32>
    %116 = math.exp %115 : vector<2x96xf32>
    %cst_20 = arith.constant 1.000000e+00 : f32
    %117 = vector.broadcast %cst_20 : f32 to vector<2x96xf32>
    %118 = arith.addf %117, %116 : vector<2x96xf32>
    %119 = arith.divf %117, %118 : vector<2x96xf32>
    %120 = vector.extract_strided_slice %113 {offsets = [0, 96], sizes = [2, 32], strides = [1, 1]} : vector<2x128xf32> to vector<2x32xf32>
    %121 = math.tanh %120 : vector<2x32xf32>
    %122 = vector.extract_strided_slice %119 {offsets = [0, 0], sizes = [2, 32], strides = [1, 1]} : vector<2x96xf32> to vector<2x32xf32>
    %123 = vector.extract_strided_slice %119 {offsets = [0, 32], sizes = [2, 32], strides = [1, 1]} : vector<2x96xf32> to vector<2x32xf32>
    %124 = vector.extract_strided_slice %119 {offsets = [0, 64], sizes = [2, 32], strides = [1, 1]} : vector<2x96xf32> to vector<2x32xf32>
    %125 = arith.mulf %123, %109 : vector<2x32xf32>
    %126 = arith.mulf %122, %121 : vector<2x32xf32>
    %127 = arith.addf %125, %126 : vector<2x32xf32>
    %128 = math.tanh %127 : vector<2x32xf32>
    %129 = arith.mulf %124, %128 : vector<2x32xf32>
    %cst_21 = arith.constant dense<0.000000e+00> : vector<2x128xf32>
    %130 = tpu.matmul %129, %26, %cst_21 {dimension_numbers = #tpu.dot_dimension_numbers<[1], [0], [0], [1], [0, 0, 1, 1], [], []>} : vector<2x32xf32>, vector<32x128xf32>, vector<2x128xf32> -> vector<2x128xf32>
    %131 = arith.addf %22, %130 : vector<2x128xf32>
    %132 = vector.extract_strided_slice %131 {offsets = [0, 0], sizes = [2, 96], strides = [1, 1]} : vector<2x128xf32> to vector<2x96xf32>
    %133 = arith.negf %132 : vector<2x96xf32>
    %134 = math.exp %133 : vector<2x96xf32>
    %cst_22 = arith.constant 1.000000e+00 : f32
    %135 = vector.broadcast %cst_22 : f32 to vector<2x96xf32>
    %136 = arith.addf %135, %134 : vector<2x96xf32>
    %137 = arith.divf %135, %136 : vector<2x96xf32>
    %138 = vector.extract_strided_slice %131 {offsets = [0, 96], sizes = [2, 32], strides = [1, 1]} : vector<2x128xf32> to vector<2x32xf32>
    %139 = math.tanh %138 : vector<2x32xf32>
    %140 = vector.extract_strided_slice %137 {offsets = [0, 0], sizes = [2, 32], strides = [1, 1]} : vector<2x96xf32> to vector<2x32xf32>
    %141 = vector.extract_strided_slice %137 {offsets = [0, 32], sizes = [2, 32], strides = [1, 1]} : vector<2x96xf32> to vector<2x32xf32>
    %142 = vector.extract_strided_slice %137 {offsets = [0, 64], sizes = [2, 32], strides = [1, 1]} : vector<2x96xf32> to vector<2x32xf32>
    %143 = arith.mulf %141, %127 : vector<2x32xf32>
    %144 = arith.mulf %140, %139 : vector<2x32xf32>
    %145 = arith.addf %143, %144 : vector<2x32xf32>
    %146 = math.tanh %145 : vector<2x32xf32>
    %147 = arith.mulf %142, %146 : vector<2x32xf32>
    %cst_23 = arith.constant dense<0.000000e+00> : vector<2x128xf32>
    %148 = tpu.matmul %147, %26, %cst_23 {dimension_numbers = #tpu.dot_dimension_numbers<[1], [0], [0], [1], [0, 0, 1, 1], [], []>} : vector<2x32xf32>, vector<32x128xf32>, vector<2x128xf32> -> vector<2x128xf32>
    %149 = arith.addf %24, %148 : vector<2x128xf32>
    %150 = vector.extract_strided_slice %149 {offsets = [0, 0], sizes = [2, 96], strides = [1, 1]} : vector<2x128xf32> to vector<2x96xf32>
    %151 = arith.negf %150 : vector<2x96xf32>
    %152 = math.exp %151 : vector<2x96xf32>
    %cst_24 = arith.constant 1.000000e+00 : f32
    %153 = vector.broadcast %cst_24 : f32 to vector<2x96xf32>
    %154 = arith.addf %153, %152 : vector<2x96xf32>
    %155 = arith.divf %153, %154 : vector<2x96xf32>
    %156 = vector.extract_strided_slice %149 {offsets = [0, 96], sizes = [2, 32], strides = [1, 1]} : vector<2x128xf32> to vector<2x32xf32>
    %157 = math.tanh %156 : vector<2x32xf32>
    %158 = vector.extract_strided_slice %155 {offsets = [0, 0], sizes = [2, 32], strides = [1, 1]} : vector<2x96xf32> to vector<2x32xf32>
    %159 = vector.extract_strided_slice %155 {offsets = [0, 32], sizes = [2, 32], strides = [1, 1]} : vector<2x96xf32> to vector<2x32xf32>
    %160 = vector.extract_strided_slice %155 {offsets = [0, 64], sizes = [2, 32], strides = [1, 1]} : vector<2x96xf32> to vector<2x32xf32>
    %161 = arith.mulf %159, %145 : vector<2x32xf32>
    %162 = arith.mulf %158, %157 : vector<2x32xf32>
    %163 = arith.addf %161, %162 : vector<2x32xf32>
    %164 = math.tanh %163 : vector<2x32xf32>
    %165 = arith.mulf %160, %164 : vector<2x32xf32>
    %166 = tpu.concatenate %39, %57, %75, %93, %111, %129, %147, %165 in 0 : vector<2x32xf32>, vector<2x32xf32>, vector<2x32xf32>, vector<2x32xf32>, vector<2x32xf32>, vector<2x32xf32>, vector<2x32xf32>, vector<2x32xf32> -> vector<16x32xf32>
    %c0_25 = arith.constant 0 : index
    %c0_26 = arith.constant 0 : index
    %c0_27 = arith.constant 0 : index
    %167 = vector.load %arg2[%c0_25, %c0_26, %c0_27] : memref<1x32x128xf32, #tpu.memory_space<vmem>>, vector<1x32x128xf32>
    %168 = vector.shape_cast %167 : vector<1x32x128xf32> to vector<32x128xf32>
    %cst_28 = arith.constant dense<0.000000e+00> : vector<16x128xf32>
    %169 = tpu.matmul %166, %168, %cst_28 {dimension_numbers = #tpu.dot_dimension_numbers<[1], [0], [0], [1], [0, 0, 1, 1], [], []>} : vector<16x32xf32>, vector<32x128xf32>, vector<16x128xf32> -> vector<16x128xf32>
    %c1 = arith.constant 1 : index
    %c0_29 = arith.constant 0 : index
    %c0_30 = arith.constant 0 : index
    %170 = vector.load %arg4[%c1, %c0_29, %c0_30] : memref<2x1x128xf32, #tpu.memory_space<vmem>>, vector<1x1x128xf32>
    %171 = vector.shape_cast %170 : vector<1x1x128xf32> to vector<1x128xf32>
    %172 = vector.broadcast %171 : vector<1x128xf32> to vector<16x128xf32>
    %173 = arith.addf %169, %172 : vector<16x128xf32>
    %174 = vector.extract_strided_slice %173 {offsets = [0, 0], sizes = [2, 128], strides = [1, 1]} : vector<16x128xf32> to vector<2x128xf32>
    %175 = vector.extract_strided_slice %173 {offsets = [2, 0], sizes = [2, 128], strides = [1, 1]} : vector<16x128xf32> to vector<2x128xf32>
    %176 = vector.extract_strided_slice %173 {offsets = [4, 0], sizes = [2, 128], strides = [1, 1]} : vector<16x128xf32> to vector<2x128xf32>
    %177 = vector.extract_strided_slice %173 {offsets = [6, 0], sizes = [2, 128], strides = [1, 1]} : vector<16x128xf32> to vector<2x128xf32>
    %178 = vector.extract_strided_slice %173 {offsets = [8, 0], sizes = [2, 128], strides = [1, 1]} : vector<16x128xf32> to vector<2x128xf32>
    %179 = vector.extract_strided_slice %173 {offsets = [10, 0], sizes = [2, 128], strides = [1, 1]} : vector<16x128xf32> to vector<2x128xf32>
    %180 = vector.extract_strided_slice %173 {offsets = [12, 0], sizes = [2, 128], strides = [1, 1]} : vector<16x128xf32> to vector<2x128xf32>
    %181 = vector.extract_strided_slice %173 {offsets = [14, 0], sizes = [2, 128], strides = [1, 1]} : vector<16x128xf32> to vector<2x128xf32>
    %c1_31 = arith.constant 1 : index
    %c0_32 = arith.constant 0 : index
    %c0_33 = arith.constant 0 : index
    %182 = vector.load %arg3[%c1_31, %c0_32, %c0_33] : memref<2x32x128xf32, #tpu.memory_space<vmem>>, vector<1x32x128xf32>
    %183 = vector.shape_cast %182 : vector<1x32x128xf32> to vector<32x128xf32>
    %184 = vector.extract_strided_slice %174 {offsets = [0, 0], sizes = [2, 96], strides = [1, 1]} : vector<2x128xf32> to vector<2x96xf32>
    %185 = arith.negf %184 : vector<2x96xf32>
    %186 = math.exp %185 : vector<2x96xf32>
    %cst_34 = arith.constant 1.000000e+00 : f32
    %187 = vector.broadcast %cst_34 : f32 to vector<2x96xf32>
    %188 = arith.addf %187, %186 : vector<2x96xf32>
    %189 = arith.divf %187, %188 : vector<2x96xf32>
    %190 = vector.extract_strided_slice %174 {offsets = [0, 96], sizes = [2, 32], strides = [1, 1]} : vector<2x128xf32> to vector<2x32xf32>
    %191 = math.tanh %190 : vector<2x32xf32>
    %192 = vector.extract_strided_slice %189 {offsets = [0, 0], sizes = [2, 32], strides = [1, 1]} : vector<2x96xf32> to vector<2x32xf32>
    %193 = vector.extract_strided_slice %189 {offsets = [0, 64], sizes = [2, 32], strides = [1, 1]} : vector<2x96xf32> to vector<2x32xf32>
    %194 = arith.mulf %192, %191 : vector<2x32xf32>
    %195 = math.tanh %194 : vector<2x32xf32>
    %196 = arith.mulf %193, %195 : vector<2x32xf32>
    %cst_35 = arith.constant dense<0.000000e+00> : vector<2x128xf32>
    %197 = tpu.matmul %196, %183, %cst_35 {dimension_numbers = #tpu.dot_dimension_numbers<[1], [0], [0], [1], [0, 0, 1, 1], [], []>} : vector<2x32xf32>, vector<32x128xf32>, vector<2x128xf32> -> vector<2x128xf32>
    %198 = arith.addf %175, %197 : vector<2x128xf32>
    %199 = vector.extract_strided_slice %198 {offsets = [0, 0], sizes = [2, 96], strides = [1, 1]} : vector<2x128xf32> to vector<2x96xf32>
    %200 = arith.negf %199 : vector<2x96xf32>
    %201 = math.exp %200 : vector<2x96xf32>
    %cst_36 = arith.constant 1.000000e+00 : f32
    %202 = vector.broadcast %cst_36 : f32 to vector<2x96xf32>
    %203 = arith.addf %202, %201 : vector<2x96xf32>
    %204 = arith.divf %202, %203 : vector<2x96xf32>
    %205 = vector.extract_strided_slice %198 {offsets = [0, 96], sizes = [2, 32], strides = [1, 1]} : vector<2x128xf32> to vector<2x32xf32>
    %206 = math.tanh %205 : vector<2x32xf32>
    %207 = vector.extract_strided_slice %204 {offsets = [0, 0], sizes = [2, 32], strides = [1, 1]} : vector<2x96xf32> to vector<2x32xf32>
    %208 = vector.extract_strided_slice %204 {offsets = [0, 32], sizes = [2, 32], strides = [1, 1]} : vector<2x96xf32> to vector<2x32xf32>
    %209 = vector.extract_strided_slice %204 {offsets = [0, 64], sizes = [2, 32], strides = [1, 1]} : vector<2x96xf32> to vector<2x32xf32>
    %210 = arith.mulf %208, %194 : vector<2x32xf32>
    %211 = arith.mulf %207, %206 : vector<2x32xf32>
    %212 = arith.addf %210, %211 : vector<2x32xf32>
    %213 = math.tanh %212 : vector<2x32xf32>
    %214 = arith.mulf %209, %213 : vector<2x32xf32>
    %cst_37 = arith.constant dense<0.000000e+00> : vector<2x128xf32>
    %215 = tpu.matmul %214, %183, %cst_37 {dimension_numbers = #tpu.dot_dimension_numbers<[1], [0], [0], [1], [0, 0, 1, 1], [], []>} : vector<2x32xf32>, vector<32x128xf32>, vector<2x128xf32> -> vector<2x128xf32>
    %216 = arith.addf %176, %215 : vector<2x128xf32>
    %217 = vector.extract_strided_slice %216 {offsets = [0, 0], sizes = [2, 96], strides = [1, 1]} : vector<2x128xf32> to vector<2x96xf32>
    %218 = arith.negf %217 : vector<2x96xf32>
    %219 = math.exp %218 : vector<2x96xf32>
    %cst_38 = arith.constant 1.000000e+00 : f32
    %220 = vector.broadcast %cst_38 : f32 to vector<2x96xf32>
    %221 = arith.addf %220, %219 : vector<2x96xf32>
    %222 = arith.divf %220, %221 : vector<2x96xf32>
    %223 = vector.extract_strided_slice %216 {offsets = [0, 96], sizes = [2, 32], strides = [1, 1]} : vector<2x128xf32> to vector<2x32xf32>
    %224 = math.tanh %223 : vector<2x32xf32>
    %225 = vector.extract_strided_slice %222 {offsets = [0, 0], sizes = [2, 32], strides = [1, 1]} : vector<2x96xf32> to vector<2x32xf32>
    %226 = vector.extract_strided_slice %222 {offsets = [0, 32], sizes = [2, 32], strides = [1, 1]} : vector<2x96xf32> to vector<2x32xf32>
    %227 = vector.extract_strided_slice %222 {offsets = [0, 64], sizes = [2, 32], strides = [1, 1]} : vector<2x96xf32> to vector<2x32xf32>
    %228 = arith.mulf %226, %212 : vector<2x32xf32>
    %229 = arith.mulf %225, %224 : vector<2x32xf32>
    %230 = arith.addf %228, %229 : vector<2x32xf32>
    %231 = math.tanh %230 : vector<2x32xf32>
    %232 = arith.mulf %227, %231 : vector<2x32xf32>
    %cst_39 = arith.constant dense<0.000000e+00> : vector<2x128xf32>
    %233 = tpu.matmul %232, %183, %cst_39 {dimension_numbers = #tpu.dot_dimension_numbers<[1], [0], [0], [1], [0, 0, 1, 1], [], []>} : vector<2x32xf32>, vector<32x128xf32>, vector<2x128xf32> -> vector<2x128xf32>
    %234 = arith.addf %177, %233 : vector<2x128xf32>
    %235 = vector.extract_strided_slice %234 {offsets = [0, 0], sizes = [2, 96], strides = [1, 1]} : vector<2x128xf32> to vector<2x96xf32>
    %236 = arith.negf %235 : vector<2x96xf32>
    %237 = math.exp %236 : vector<2x96xf32>
    %cst_40 = arith.constant 1.000000e+00 : f32
    %238 = vector.broadcast %cst_40 : f32 to vector<2x96xf32>
    %239 = arith.addf %238, %237 : vector<2x96xf32>
    %240 = arith.divf %238, %239 : vector<2x96xf32>
    %241 = vector.extract_strided_slice %234 {offsets = [0, 96], sizes = [2, 32], strides = [1, 1]} : vector<2x128xf32> to vector<2x32xf32>
    %242 = math.tanh %241 : vector<2x32xf32>
    %243 = vector.extract_strided_slice %240 {offsets = [0, 0], sizes = [2, 32], strides = [1, 1]} : vector<2x96xf32> to vector<2x32xf32>
    %244 = vector.extract_strided_slice %240 {offsets = [0, 32], sizes = [2, 32], strides = [1, 1]} : vector<2x96xf32> to vector<2x32xf32>
    %245 = vector.extract_strided_slice %240 {offsets = [0, 64], sizes = [2, 32], strides = [1, 1]} : vector<2x96xf32> to vector<2x32xf32>
    %246 = arith.mulf %244, %230 : vector<2x32xf32>
    %247 = arith.mulf %243, %242 : vector<2x32xf32>
    %248 = arith.addf %246, %247 : vector<2x32xf32>
    %249 = math.tanh %248 : vector<2x32xf32>
    %250 = arith.mulf %245, %249 : vector<2x32xf32>
    %cst_41 = arith.constant dense<0.000000e+00> : vector<2x128xf32>
    %251 = tpu.matmul %250, %183, %cst_41 {dimension_numbers = #tpu.dot_dimension_numbers<[1], [0], [0], [1], [0, 0, 1, 1], [], []>} : vector<2x32xf32>, vector<32x128xf32>, vector<2x128xf32> -> vector<2x128xf32>
    %252 = arith.addf %178, %251 : vector<2x128xf32>
    %253 = vector.extract_strided_slice %252 {offsets = [0, 0], sizes = [2, 96], strides = [1, 1]} : vector<2x128xf32> to vector<2x96xf32>
    %254 = arith.negf %253 : vector<2x96xf32>
    %255 = math.exp %254 : vector<2x96xf32>
    %cst_42 = arith.constant 1.000000e+00 : f32
    %256 = vector.broadcast %cst_42 : f32 to vector<2x96xf32>
    %257 = arith.addf %256, %255 : vector<2x96xf32>
    %258 = arith.divf %256, %257 : vector<2x96xf32>
    %259 = vector.extract_strided_slice %252 {offsets = [0, 96], sizes = [2, 32], strides = [1, 1]} : vector<2x128xf32> to vector<2x32xf32>
    %260 = math.tanh %259 : vector<2x32xf32>
    %261 = vector.extract_strided_slice %258 {offsets = [0, 0], sizes = [2, 32], strides = [1, 1]} : vector<2x96xf32> to vector<2x32xf32>
    %262 = vector.extract_strided_slice %258 {offsets = [0, 32], sizes = [2, 32], strides = [1, 1]} : vector<2x96xf32> to vector<2x32xf32>
    %263 = vector.extract_strided_slice %258 {offsets = [0, 64], sizes = [2, 32], strides = [1, 1]} : vector<2x96xf32> to vector<2x32xf32>
    %264 = arith.mulf %262, %248 : vector<2x32xf32>
    %265 = arith.mulf %261, %260 : vector<2x32xf32>
    %266 = arith.addf %264, %265 : vector<2x32xf32>
    %267 = math.tanh %266 : vector<2x32xf32>
    %268 = arith.mulf %263, %267 : vector<2x32xf32>
    %cst_43 = arith.constant dense<0.000000e+00> : vector<2x128xf32>
    %269 = tpu.matmul %268, %183, %cst_43 {dimension_numbers = #tpu.dot_dimension_numbers<[1], [0], [0], [1], [0, 0, 1, 1], [], []>} : vector<2x32xf32>, vector<32x128xf32>, vector<2x128xf32> -> vector<2x128xf32>
    %270 = arith.addf %179, %269 : vector<2x128xf32>
    %271 = vector.extract_strided_slice %270 {offsets = [0, 0], sizes = [2, 96], strides = [1, 1]} : vector<2x128xf32> to vector<2x96xf32>
    %272 = arith.negf %271 : vector<2x96xf32>
    %273 = math.exp %272 : vector<2x96xf32>
    %cst_44 = arith.constant 1.000000e+00 : f32
    %274 = vector.broadcast %cst_44 : f32 to vector<2x96xf32>
    %275 = arith.addf %274, %273 : vector<2x96xf32>
    %276 = arith.divf %274, %275 : vector<2x96xf32>
    %277 = vector.extract_strided_slice %270 {offsets = [0, 96], sizes = [2, 32], strides = [1, 1]} : vector<2x128xf32> to vector<2x32xf32>
    %278 = math.tanh %277 : vector<2x32xf32>
    %279 = vector.extract_strided_slice %276 {offsets = [0, 0], sizes = [2, 32], strides = [1, 1]} : vector<2x96xf32> to vector<2x32xf32>
    %280 = vector.extract_strided_slice %276 {offsets = [0, 32], sizes = [2, 32], strides = [1, 1]} : vector<2x96xf32> to vector<2x32xf32>
    %281 = vector.extract_strided_slice %276 {offsets = [0, 64], sizes = [2, 32], strides = [1, 1]} : vector<2x96xf32> to vector<2x32xf32>
    %282 = arith.mulf %280, %266 : vector<2x32xf32>
    %283 = arith.mulf %279, %278 : vector<2x32xf32>
    %284 = arith.addf %282, %283 : vector<2x32xf32>
    %285 = math.tanh %284 : vector<2x32xf32>
    %286 = arith.mulf %281, %285 : vector<2x32xf32>
    %cst_45 = arith.constant dense<0.000000e+00> : vector<2x128xf32>
    %287 = tpu.matmul %286, %183, %cst_45 {dimension_numbers = #tpu.dot_dimension_numbers<[1], [0], [0], [1], [0, 0, 1, 1], [], []>} : vector<2x32xf32>, vector<32x128xf32>, vector<2x128xf32> -> vector<2x128xf32>
    %288 = arith.addf %180, %287 : vector<2x128xf32>
    %289 = vector.extract_strided_slice %288 {offsets = [0, 0], sizes = [2, 96], strides = [1, 1]} : vector<2x128xf32> to vector<2x96xf32>
    %290 = arith.negf %289 : vector<2x96xf32>
    %291 = math.exp %290 : vector<2x96xf32>
    %cst_46 = arith.constant 1.000000e+00 : f32
    %292 = vector.broadcast %cst_46 : f32 to vector<2x96xf32>
    %293 = arith.addf %292, %291 : vector<2x96xf32>
    %294 = arith.divf %292, %293 : vector<2x96xf32>
    %295 = vector.extract_strided_slice %288 {offsets = [0, 96], sizes = [2, 32], strides = [1, 1]} : vector<2x128xf32> to vector<2x32xf32>
    %296 = math.tanh %295 : vector<2x32xf32>
    %297 = vector.extract_strided_slice %294 {offsets = [0, 0], sizes = [2, 32], strides = [1, 1]} : vector<2x96xf32> to vector<2x32xf32>
    %298 = vector.extract_strided_slice %294 {offsets = [0, 32], sizes = [2, 32], strides = [1, 1]} : vector<2x96xf32> to vector<2x32xf32>
    %299 = vector.extract_strided_slice %294 {offsets = [0, 64], sizes = [2, 32], strides = [1, 1]} : vector<2x96xf32> to vector<2x32xf32>
    %300 = arith.mulf %298, %284 : vector<2x32xf32>
    %301 = arith.mulf %297, %296 : vector<2x32xf32>
    %302 = arith.addf %300, %301 : vector<2x32xf32>
    %303 = math.tanh %302 : vector<2x32xf32>
    %304 = arith.mulf %299, %303 : vector<2x32xf32>
    %cst_47 = arith.constant dense<0.000000e+00> : vector<2x128xf32>
    %305 = tpu.matmul %304, %183, %cst_47 {dimension_numbers = #tpu.dot_dimension_numbers<[1], [0], [0], [1], [0, 0, 1, 1], [], []>} : vector<2x32xf32>, vector<32x128xf32>, vector<2x128xf32> -> vector<2x128xf32>
    %306 = arith.addf %181, %305 : vector<2x128xf32>
    %307 = vector.extract_strided_slice %306 {offsets = [0, 0], sizes = [2, 96], strides = [1, 1]} : vector<2x128xf32> to vector<2x96xf32>
    %308 = arith.negf %307 : vector<2x96xf32>
    %309 = math.exp %308 : vector<2x96xf32>
    %cst_48 = arith.constant 1.000000e+00 : f32
    %310 = vector.broadcast %cst_48 : f32 to vector<2x96xf32>
    %311 = arith.addf %310, %309 : vector<2x96xf32>
    %312 = arith.divf %310, %311 : vector<2x96xf32>
    %313 = vector.extract_strided_slice %306 {offsets = [0, 96], sizes = [2, 32], strides = [1, 1]} : vector<2x128xf32> to vector<2x32xf32>
    %314 = math.tanh %313 : vector<2x32xf32>
    %315 = vector.extract_strided_slice %312 {offsets = [0, 0], sizes = [2, 32], strides = [1, 1]} : vector<2x96xf32> to vector<2x32xf32>
    %316 = vector.extract_strided_slice %312 {offsets = [0, 32], sizes = [2, 32], strides = [1, 1]} : vector<2x96xf32> to vector<2x32xf32>
    %317 = vector.extract_strided_slice %312 {offsets = [0, 64], sizes = [2, 32], strides = [1, 1]} : vector<2x96xf32> to vector<2x32xf32>
    %318 = arith.mulf %316, %302 : vector<2x32xf32>
    %319 = arith.mulf %315, %314 : vector<2x32xf32>
    %320 = arith.addf %318, %319 : vector<2x32xf32>
    %321 = math.tanh %320 : vector<2x32xf32>
    %322 = arith.mulf %317, %321 : vector<2x32xf32>
    %c0_49 = arith.constant 0 : index
    %c0_50 = arith.constant 0 : index
    %323 = vector.load %arg5[%c0_49, %c0_50] : memref<2x32xf32, #tpu.memory_space<vmem>>, vector<2x32xf32>
    tpu.vector_store %arg5[%c0_49, %c0_50], %322 {strides = array<i32>} : memref<2x32xf32, #tpu.memory_space<vmem>>, vector<2x32xf32>,
    return
  }
}

</mosaic_0001>

<bundles_post_ra>
// kernel: encoder_forward.1
= control target key start
LH: loop header
LB: loop body
LE: loop exit
PB: predicated region body
PF: predicated region fallthrough
CT: control target
= control target key end

     0   :  { %10 = vsyncpa [#allocation3], 0  ;;  %s2353_s0 = inlined_call_operand.hbm [shape: f32[2,8,16], index: 0, kind: input, shape index: {}]   ;;  %s2354_s1 = inlined_call_operand.hbm [shape: f32[16,128], index: 1, kind: input, shape index: {}]   ;;  %s2355_s2 = inlined_call_operand.hbm [shape: f32[1,32,128], index: 2, kind: input, shape index: {}]   ;;  %s2356_s3 = inlined_call_operand.hbm [shape: f32[2,32,128], index: 3, kind: input, shape index: {}]   ;;  %s2357_s4 = inlined_call_operand.vmem [shape: f32[2,1,128], index: 4, kind: input, shape index: {}]   ;;  %s2358_s5 = inlined_call_operand.hbm [shape: f32[2,32], index: 5, kind: output, shape index: {}]  }
   0x1   :  { %11 = vsyncpa [#allocation6], 0 }
   0x2   :  { %12 = vsyncpa [#allocation9], 0 }
   0x3   :  { %13 = vsyncpa [#allocation4], 0  ;;  %s31_s20 = sshll.u32 %s2354_s1, 4  ;;  %s2006_s21 = smov [#allocation5]   ;;  %s32_s20 = int_to_ptr.hbm [resolvable:$true] %s31_s20 }
   0x4   :  { %s33_s22 = sshll.u32 %s2006_s21, 4  ;;  %s18_s25 = sshll.u32 %s2353_s0, 4  ;;  %s34_s22 = int_to_ptr.vmem [resolvable:$true] %s33_s22  ;;  %s19_s25 = int_to_ptr.hbm [resolvable:$true] %s18_s25 }
   0x5   :  { %s2007_s26 = smov 128   ;;  %s2008_s27 = smov 8  }
   0x6   :  { %39 = dma.hbm_to_vmem [thread:$0]  %s32_s20, 256, %s34_s22, [#allocation6], %s2007_s26, %s2007_s26, %s2008_s27  }
   0x7   :  { %s2009_s28 = smov [#allocation2]   ;;  %s44_s7 = sshll.u32 %s2355_s2, 4  ;;  %s45_s7 = int_to_ptr.hbm [resolvable:$true] %s44_s7 }
   0x8   :  { %s20_s29 = sshll.u32 %s2009_s28, 4  ;;  %s57_s9 = sshll.u32 %s2356_s3, 4  ;;  %s21_s29 = int_to_ptr.vmem [resolvable:$true] %s20_s29  ;;  %s58_s9 = int_to_ptr.hbm [resolvable:$true] %s57_s9 }
   0x9   :  { %26 = dma.hbm_to_vmem [thread:$0]  %s19_s25, 256, %s21_s29, [#allocation3], %s2007_s26, %s2007_s26, %s2008_s27  }
   0xa   :  { %s2010_s10 = smov [#allocation7]   ;;  %s2011_s0 = smov [#allocation8]  }
   0xb   :  { %s46_s11 = sshll.u32 %s2010_s10, 4  ;;  %s59_s12 = sshll.u32 %s2011_s0, 4  ;;  %s47_s11 = int_to_ptr.vmem [resolvable:$true] %s46_s11  ;;  %s60_s12 = int_to_ptr.vmem [resolvable:$true] %s59_s12 }
   0xc   :  { %52 = dma.hbm_to_vmem [thread:$0]  %s45_s7, 512, %s47_s11, [#allocation6], %s2007_s26, %s2007_s26, %s2008_s27  }
   0xd   :  { %65 = dma.hbm_to_vmem [thread:$0]  %s58_s9, 1024, %s60_s12, [#allocation9], %s2007_s26, %s2007_s26, %s2008_s27  }
   0xe   :  { %1998 = dma.done.wait [#allocation3], 256  }
   0xf   :  { %1999 = vsyncadd [#allocation3], 4294967040 }
  0x10   :  { %2000 = dma.done.wait [#allocation6], 768  }
  0x11   :  { %2001 = vsyncadd [#allocation6], 4294966528 }
  0x12   :  { %2002 = dma.done.wait [#allocation9], 1024  }
  0x13   :  { %2003 = vsyncadd [#allocation9], 4294966272  ;;  %v87_v0 = vld [vmem:[#allocation5 + $0x8] sm:$0xff]  ;;  %v86_v1 = vld [vmem:[#allocation5] sm:$0xff]  ;;  %vm92_vm0 = vcmask 130048   ;;  %s2012_s13 = smov 32  }
  0x14   :  { %113 = vmatpush.msra.mxu0 %v87_v0  ;;  %v84_v2 = vld [vmem:[#allocation2] sm:$0xff]  ;;  %v85_v3 = vld [vmem:[#allocation2 + $0x8] sm:$0xff]  ;;  %s2013_s14 = smov 64   ;;  %v125_v44 = vld [vmem:[#allocation8 + $0x18] sm:$0xff]  ;;  %vm191_vm9 = vcmask 1041409   ;;  %vm195_vm10 = vcmask 261120  }
  0x15   :  { %v1684_v5 = vld [vmem:[%s2357_s4] ss:$0 sm:$0xff]  ;;  %v124_v45 = vld [vmem:[#allocation8 + $0x10] sm:$0xff]  ;;  %210 = vmatpush.msra.mxu1 %v125_v44  ;;  %328 = vmatpush.msra.mxu2 %v125_v44  ;;  %v123_v46 = vld [vmem:[#allocation8 + $0x8] sm:$0xff]  ;;  %s1620_s20 = sshll.u32 %s2358_s5, 4  ;;  %s1621_s20 = int_to_ptr.hbm [resolvable:$true] %s1620_s20 }
  0x16   :  { %114 = vmatpush.msra.mxu0 %v86_v1  ;;  %444 = vmatpush.msra.mxu3 %v125_v44  ;;  %v122_v47 = vld [vmem:[#allocation8] sm:$0xff] }
  0x17   :  { %1632 = vmatmul.msk.f32.vlgmr.msra.gmra.mxu0 %vm92_vm0, %v84_v2  ;;  %211 = vmatpush.msra.mxu1 %v124_v45 }
  0x18   :  { %908 = vmatpush.msrb.mxu0 %v125_v44  ;;  %329 = vmatpush.msra.mxu2 %v124_v45 }
  0x19   :  { %445 = vmatpush.msra.mxu3 %v124_v45  ;;  %212 = vmatpush.msra.mxu1 %v123_v46 }
  0x1a   :  { %909 = vmatpush.msrb.mxu0 %v124_v45  ;;  %330 = vmatpush.msra.mxu2 %v123_v46 }
  0x1b   :  { %446 = vmatpush.msra.mxu3 %v123_v46  ;;  %213 = vmatpush.msra.mxu1 %v122_v47 }
  0x1c   :  { %910 = vmatpush.msrb.mxu0 %v123_v46  ;;  %331 = vmatpush.msra.mxu2 %v122_v47 }
  0x1d   :  { %447 = vmatpush.msra.mxu3 %v122_v47  ;;  %560 = vmatpush.msrb.mxu1 %v125_v44 }
  0x1e   :  { %676 = vmatpush.msrb.mxu2 %v125_v44  ;;  %911 = vmatpush.msrb.mxu0 %v122_v47 }
  0x1f   :  { %1633 = vmatmul.msk.f32.gmra.mxu0 %vm92_vm0, %v85_v3  ;;  %792 = vmatpush.msrb.mxu3 %v125_v44 }
  0x20   :  { %561 = vmatpush.msrb.mxu1 %v124_v45  ;;  %677 = vmatpush.msrb.mxu2 %v124_v45 }
  0x21   :  { %793 = vmatpush.msrb.mxu3 %v124_v45 }
  0x22   :  { %562 = vmatpush.msrb.mxu1 %v123_v46  ;;  %678 = vmatpush.msrb.mxu2 %v123_v46 }
  0x23   :  { %794 = vmatpush.msrb.mxu3 %v123_v46 }
  0x24   :  { %563 = vmatpush.msrb.mxu1 %v122_v47  ;;  %679 = vmatpush.msrb.mxu2 %v122_v47 }
  0x25   :  { %795 = vmatpush.msrb.mxu3 %v122_v47 }
  0x94   :  { %v116_v4 = vpop.f32.mrf.mxu0 }
  0x95   :  { %v2063_v8 = vadd.f32 %v1684_v5, %v116_v4 }
  0x97   :  { %v1634_v12 = vmul.f32 -1.442695, %v2063_v8 }
  0x9c   :  { %v119_v6 = vpop.f32.mrf.mxu0 }
  0x9d   :  { %v2060_v7 = vadd.f32 %v1684_v5, %v119_v6 }
  0x9f   :  { %1686 = vtanh.f32 %v2060_v7  ;;  %v1635_v11 = vmul.f32 -1.442695, %v2060_v7 }
  0xa0   :  { %1688 = vtanh.f32 %v2063_v8 }
  0xa1   :  { %1690 = vpow2.f32 %v1635_v11 }
  0xa2   :  { %1692 = vpow2.f32 %v1634_v12 }
  0xa5   :  { %v1687_v9 = vpop.eup %1686 }
  0xa6   :  { %170 = vrot.lane.b32.xlu0 %v1687_v9, %s2012_s13  ;;  %v1689_v10 = vpop.eup %1688 }
  0xa7   :  { %v1691_v13 = vpop.eup %1690 }
  0xa8   :  { %v133_v14 = vadd.f32 1.0, %v1691_v13  ;;  %v1693_v15 = vpop.eup %1692 }
  0xa9   :  { %v132_v16 = vadd.f32 1.0, %v1693_v15 }
  0xaa   :  { %1694 = vrcp.f32 %v133_v14  ;;  %v160_v25 = vand.u32 2147483648, %v133_v14  ;;  %vm154_vm2 = vweird.f32 %v133_v14  ;;  %v158_v26 = vand.u32 2147483647, %v133_v14 }
  0xab   :  { %1696 = vrcp.f32 %v132_v16  ;;  %v145_v34 = vand.u32 2147483648, %v132_v16  ;;  %vm139_vm6 = vweird.f32 %v132_v16  ;;  %v143_v35 = vand.u32 2147483647, %v132_v16 }
  0xac   :  { %v161_v29 = vor.u32 1.1754944e-38, %v160_v25  ;;  %vm159_vm4 = vcmp.eq.f32.partialorder %v158_v26, 8.507059e+37 }
  0xad   :  { %v146_v37 = vor.u32 1.1754944e-38, %v145_v34  ;;  %vm144_vm8 = vcmp.eq.f32.partialorder %v143_v35, 8.507059e+37 }
  0xae   :  { %168 = vrot.lane.b32.xlu0 %v1689_v10, %s2012_s13 }
  0xb0   :  { %v1695_v17 = vpop.eup %1694 }
  0xb1   :  { %v150_v18 = vmul.f32 %v1695_v17, %v133_v14  ;;  %v1697_v20 = vpop.eup %1696  ;;  %vm155_vm1 = vweird.f32 %v1695_v17 }
  0xb2   :  { %v135_v22 = vmul.f32 %v1697_v20, %v132_v16  ;;  %vm156_vm3 = vmor %vm154_vm2, %vm155_vm1  ;;  %vm140_vm5 = vweird.f32 %v1697_v20 }
  0xb3   :  { %v151_v19 = vsub.f32 1.0, %v150_v18  ;;  %vm141_vm7 = vmor %vm139_vm6, %vm140_vm5 }
  0xb4   :  { %v136_v24 = vsub.f32 1.0, %v135_v22 }
  0xb5   :  { %v152_v21 = vmul.f32 %v1695_v17, %v151_v19 }
  0xb6   :  { %v137_v28 = vmul.f32 %v1697_v20, %v136_v24 }
  0xb7   :  { %v153_v23 = vadd.f32 %v1695_v17, %v152_v21 }
  0xb8   :  { %v138_v33 = vadd.f32 %v1697_v20, %v137_v28 }
  0xb9   :  { %v157_v27 = vsel %vm156_vm3, %v1695_v17, %v153_v23  ;;  %vm1006_vm3 = vcmask 1043459  }
  0xba   :  { %v162_v31 = vsel %vm159_vm4, %v161_v29, %v157_v27  ;;  %v142_v36 = vsel %vm141_vm7, %v1697_v20, %v138_v33 }
  0xbb   :  { %v147_v39 = vsel %vm144_vm8, %v146_v37, %v142_v36 }
 0x118   :  { %v171_v30 = vpop.permute.xlu0 %170 }
 0x119   :  { %v2070_v32 = vmul.f32 %v171_v30, %v162_v31 }
 0x11b   :  { %1698 = vtanh.f32 %v2070_v32  ;;  %v267_v61 = vrot.slane %v2070_v32, 7 }
 0x120   :  { %v169_v38 = vpop.permute.xlu0 %168 }
 0x121   :  { %v1699_v40 = vpop.eup %1698  ;;  %v174_v41 = vmul.f32 %v169_v38, %v147_v39 }
 0x122   :  { %182 = vrot.lane.b32.xlu1 %v1699_v40, %s2013_s14 }
 0x123   :  { %1700 = vtanh.f32 %v174_v41  ;;  %v266_v43 = vrot.slane %v174_v41, 7 }
 0x129   :  { %v1701_v42 = vpop.eup %1700 }
 0x12a   :  { %180 = vrot.lane.b32.xlu1 %v1701_v42, %s2013_s14 }
 0x132   :  { %268 = vrot.lane.b32.xlu1 %v266_v43, %s2012_s13 }
 0x194   :  { %v183_v48 = vpop.permute.xlu1 %182 }
 0x195   :  { %v187_v49 = vmul.f32 %v183_v48, %v162_v31 }
 0x197   :  { %v190_v51 = vrot.slane %v187_v49, 7 }
 0x19c   :  { %v181_v50 = vpop.permute.xlu1 %180 }
 0x19d   :  { %v186_v52 = vmul.f32 %v181_v50, %v147_v39 }
 0x19f   :  { %v2077_v53 = vsel %vm191_vm9, %v190_v51, %v186_v52 }
 0x1a0   :  { %193 = vrot.lane.b32.xlu2 %v2077_v53, %s2013_s14 }
 0x1a4   :  { %v269_v30 = vpop.permute.xlu1 %268 }
 0x1fa   :  { %v194_v54 = vpop.permute.xlu2 %193 }
 0x1fb   :  { %1636 = vmatmul.msk.f32.vlgmr.msra.gmra.mxu1 %vm195_vm10, %v194_v54 }
 0x278   :  { %v215_v55 = vpop.f32.mrf.mxu1 }
 0x279   :  { %v219_v56 = vrot.slane %v215_v55, 7  ;;  %v223_v57 = vadd.f32 %v215_v55, %v2060_v7 }
 0x27b   :  { %v222_v58 = vadd.f32 %v219_v56, %v2063_v8  ;;  %1702 = vtanh.f32 %v223_v57  ;;  %v1638_v1 = vmul.f32 -1.442695, %v223_v57 }
 0x27d   :  { %1704 = vtanh.f32 %v222_v58  ;;  %v1637_v62 = vmul.f32 -1.442695, %v222_v58 }
 0x27f   :  { %1706 = vpow2.f32 %v1637_v62 }
 0x281   :  { %v1703_v59 = vpop.eup %1702 }
 0x282   :  { %280 = vrot.lane.b32.xlu0 %v1703_v59, %s2012_s13 }
 0x283   :  { %v1705_v60 = vpop.eup %1704 }
 0x284   :  { %278 = vrot.lane.b32.xlu2 %v1705_v60, %s2012_s13 }
 0x285   :  { %v1707_v63 = vpop.eup %1706 }
 0x286   :  { %v230_v0 = vadd.f32 1.0, %v1707_v63 }
 0x288   :  { %1708 = vrcp.f32 %v230_v0  ;;  %v243_v11 = vand.u32 2147483648, %v230_v0  ;;  %vm237_vm12 = vweird.f32 %v230_v0  ;;  %v241_v12 = vand.u32 2147483647, %v230_v0 }
 0x289   :  { %1710 = vpow2.f32 %v1638_v1 }
 0x28a   :  { %v244_v14 = vor.u32 1.1754944e-38, %v243_v11  ;;  %vm242_vm14 = vcmp.eq.f32.partialorder %v241_v12, 8.507059e+37 }
 0x28c   :  { %270 = vrot.lane.b32.xlu2 %v267_v61, %s2012_s13 }
 0x28e   :  { %v1709_v2 = vpop.eup %1708 }
 0x28f   :  { %v233_v3 = vmul.f32 %v1709_v2, %v230_v0  ;;  %v1711_v5 = vpop.eup %1710  ;;  %vm238_vm11 = vweird.f32 %v1709_v2 }
 0x290   :  { %v231_v6 = vadd.f32 1.0, %v1711_v5  ;;  %vm239_vm13 = vmor %vm237_vm12, %vm238_vm11 }
 0x291   :  { %v234_v4 = vsub.f32 1.0, %v233_v3 }
 0x292   :  { %1712 = vrcp.f32 %v231_v6  ;;  %v258_v23 = vand.u32 2147483648, %v231_v6  ;;  %vm252_vm0 = vweird.f32 %v231_v6  ;;  %v256_v24 = vand.u32 2147483647, %v231_v6 }
 0x293   :  { %v235_v9 = vmul.f32 %v1709_v2, %v234_v4 }
 0x294   :  { %v259_v26 = vor.u32 1.1754944e-38, %v258_v23  ;;  %vm257_vm2 = vcmp.eq.f32.partialorder %v256_v24, 8.507059e+37 }
 0x295   :  { %v236_v10 = vadd.f32 %v1709_v2, %v235_v9 }
 0x297   :  { %v240_v13 = vsel %vm239_vm13, %v1709_v2, %v236_v10 }
 0x298   :  { %v1713_v15 = vpop.eup %1712  ;;  %v245_v17 = vsel %vm242_vm14, %v244_v14, %v240_v13  ;;  %vm1011_vm14 = vcmask 1045509  }
 0x299   :  { %v248_v19 = vmul.f32 %v1713_v15, %v231_v6  ;;  %vm253_vm15 = vweird.f32 %v1713_v15  ;;  %v274_v31 = vmul.f32 %v269_v30, %v245_v17 }
 0x29a   :  { %vm254_vm1 = vmor %vm252_vm0, %vm253_vm15  ;;  %vm1033_vm15 = vcmask 1041408   ;;  %vm1035_vm0 = vcmask 1043456  }
 0x29b   :  { %v249_v20 = vsub.f32 1.0, %v248_v19 }
 0x29d   :  { %v250_v21 = vmul.f32 %v1713_v15, %v249_v20 }
 0x29f   :  { %v251_v22 = vadd.f32 %v1713_v15, %v250_v21 }
 0x2a1   :  { %v255_v25 = vsel %vm254_vm1, %v1713_v15, %v251_v22 }
 0x2a2   :  { %v260_v27 = vsel %vm257_vm2, %v259_v26, %v255_v25 }
 0x2de   :  { %v279_v16 = vpop.permute.xlu2 %278 }
 0x2df   :  { %v284_v18 = vmul.f32 %v279_v16, %v245_v17 }
 0x2e1   :  { %288 = vrot.lane.b32.xlu0 %v284_v18, %s2012_s13 }
 0x2e6   :  { %v271_v35 = vpop.permute.xlu2 %270 }
 0x2e7   :  { %v275_v36 = vmul.f32 %v271_v35, %v260_v27 }
 0x2f4   :  { %v281_v28 = vpop.permute.xlu0 %280 }
 0x2f5   :  { %v285_v29 = vmul.f32 %v281_v28, %v260_v27 }
 0x2f7   :  { %290 = vrot.lane.b32.xlu1 %v285_v29, %s2012_s13 }
 0x353   :  { %v289_v32 = vpop.permute.xlu0 %288 }
 0x354   :  { %v2090_v33 = vadd.f32 %v289_v32, %v274_v31 }
 0x356   :  { %1714 = vtanh.f32 %v2090_v33  ;;  %v385_v26 = vrot.slane %v2090_v33, 7 }
 0x35c   :  { %v1715_v34 = vpop.eup %1714 }
 0x35d   :  { %300 = vrot.lane.b32.xlu2 %v1715_v34, %s2012_s13 }
 0x369   :  { %v291_v37 = vpop.permute.xlu1 %290 }
 0x36a   :  { %v2094_v38 = vadd.f32 %v291_v37, %v275_v36 }
 0x36c   :  { %1716 = vtanh.f32 %v2094_v38 }
 0x372   :  { %v1717_v39 = vpop.eup %1716 }
 0x373   :  { %302 = vrot.lane.b32.xlu0 %v1717_v39, %s2012_s13 }
 0x3b7   :  { %v301_v40 = vpop.permute.xlu2 %300 }
 0x3b8   :  { %v306_v41 = vmul.f32 %v301_v40, %v245_v17 }
 0x3ba   :  { %v310_v43 = vrot.slane %v306_v41, 1  ;;  %v1004_v45 = vrot.slane %v306_v41, 7 }
 0x3e5   :  { %v303_v42 = vpop.permute.xlu0 %302 }
 0x3e6   :  { %v307_v44 = vmul.f32 %v303_v42, %v260_v27  ;;  %v386_v27 = vrot.slane %v2094_v38, 7 }
 0x3e8   :  { %v1005_v46 = vrot.slane %v307_v44, 6  ;;  %v311_v47 = vsel %vm191_vm9, %v307_v44, %v310_v43 }
 0x3e9   :  { %312 = vrot.lane.b32.xlu1 %v311_v47, %s2013_s14 }
 0x3ea   :  { %v2101_v48 = vsel %vm1006_vm3, %v1005_v46, %v1004_v45 }
 0x3eb   :  { %v1034_v46 = vsel %vm1033_vm15, %v2077_v53, %v2101_v48 }
 0x45b   :  { %v313_v49 = vpop.permute.xlu1 %312 }
 0x45c   :  { %1639 = vmatmul.msk.f32.vlgmr.msra.gmra.mxu2 %vm195_vm10, %v313_v49 }
 0x4df   :  { %v333_v50 = vpop.f32.mrf.mxu2 }
 0x4e0   :  { %v337_v51 = vrot.slane %v333_v50, 6  ;;  %v338_v52 = vrot.slane %v333_v50, 7 }
 0x4e2   :  { %v341_v54 = vadd.f32 %v337_v51, %v2063_v8  ;;  %v342_v55 = vadd.f32 %v338_v52, %v2060_v7 }
 0x4e4   :  { %1718 = vtanh.f32 %v341_v54  ;;  %v1640_v58 = vmul.f32 -1.442695, %v341_v54  ;;  %v1641_v62 = vmul.f32 -1.442695, %v342_v55 }
 0x4e5   :  { %1720 = vtanh.f32 %v342_v55 }
 0x4e6   :  { %1722 = vpow2.f32 %v1640_v58 }
 0x4ea   :  { %v1719_v56 = vpop.eup %1718 }
 0x4eb   :  { %v1721_v57 = vpop.eup %1720  ;;  %393 = vrot.lane.b32.xlu2 %v1719_v56, %s2012_s13 }
 0x4ec   :  { %395 = vrot.lane.b32.xlu0 %v1721_v57, %s2012_s13  ;;  %v1723_v59 = vpop.eup %1722 }
 0x4ed   :  { %v349_v60 = vadd.f32 1.0, %v1723_v59 }
 0x4ef   :  { %1724 = vrcp.f32 %v349_v60  ;;  %v362_v5 = vand.u32 2147483648, %v349_v60  ;;  %vm356_vm5 = vweird.f32 %v349_v60  ;;  %v360_v6 = vand.u32 2147483647, %v349_v60 }
 0x4f0   :  { %1726 = vpow2.f32 %v1641_v62 }
 0x4f1   :  { %v363_v10 = vor.u32 1.1754944e-38, %v362_v5  ;;  %vm361_vm7 = vcmp.eq.f32.partialorder %v360_v6, 8.507059e+37 }
 0x4f5   :  { %v1725_v61 = vpop.eup %1724 }
 0x4f6   :  { %v352_v63 = vmul.f32 %v1725_v61, %v349_v60  ;;  %v1727_v2 = vpop.eup %1726  ;;  %vm357_vm4 = vweird.f32 %v1725_v61 }
 0x4f7   :  { %v350_v3 = vadd.f32 1.0, %v1727_v2  ;;  %vm358_vm6 = vmor %vm356_vm5, %vm357_vm4 }
 0x4f8   :  { %v353_v0 = vsub.f32 1.0, %v352_v63 }
 0x4f9   :  { %1728 = vrcp.f32 %v350_v3  ;;  %v377_v19 = vand.u32 2147483648, %v350_v3  ;;  %vm371_vm11 = vweird.f32 %v350_v3  ;;  %v375_v20 = vand.u32 2147483647, %v350_v3 }
 0x4fa   :  { %v354_v1 = vmul.f32 %v1725_v61, %v353_v0 }
 0x4fb   :  { %v378_v22 = vor.u32 1.1754944e-38, %v377_v19  ;;  %vm376_vm13 = vcmp.eq.f32.partialorder %v375_v20, 8.507059e+37 }
 0x4fc   :  { %v355_v4 = vadd.f32 %v1725_v61, %v354_v1 }
 0x4fe   :  { %v359_v9 = vsel %vm358_vm6, %v1725_v61, %v355_v4 }
 0x4ff   :  { %v364_v12 = vsel %vm361_vm7, %v363_v10, %v359_v9  ;;  %v1729_v14 = vpop.eup %1728 }
 0x500   :  { %v367_v15 = vmul.f32 %v1729_v14, %v350_v3  ;;  %vm372_vm8 = vweird.f32 %v1729_v14  ;;  %v389_v28 = vmul.f32 %v385_v26, %v364_v12 }
 0x501   :  { %vm373_vm12 = vmor %vm371_vm11, %vm372_vm8 }
 0x502   :  { %v368_v16 = vsub.f32 1.0, %v367_v15 }
 0x504   :  { %v369_v17 = vmul.f32 %v1729_v14, %v368_v16 }
 0x506   :  { %v370_v18 = vadd.f32 %v1729_v14, %v369_v17 }
 0x508   :  { %v374_v21 = vsel %vm373_vm12, %v1729_v14, %v370_v18  ;;  %vm2360_vm12 = vcmask 1047559  }
 0x509   :  { %v379_v24 = vsel %vm376_vm13, %v378_v22, %v374_v21  ;;  %vm2359_vm13 = vcmask 1045504  }
 0x50a   :  { %v390_v29 = vmul.f32 %v386_v27, %v379_v24 }
 0x545   :  { %v394_v11 = vpop.permute.xlu2 %393 }
 0x546   :  { %v399_v13 = vmul.f32 %v394_v11, %v364_v12 }
 0x548   :  { %403 = vrot.lane.b32.xlu1 %v399_v13, %s2012_s13 }
 0x55e   :  { %v396_v23 = vpop.permute.xlu0 %395 }
 0x55f   :  { %v400_v25 = vmul.f32 %v396_v23, %v379_v24 }
 0x561   :  { %405 = vrot.lane.b32.xlu2 %v400_v25, %s2012_s13 }
 0x5ba   :  { %v404_v30 = vpop.permute.xlu1 %403 }
 0x5bb   :  { %v406_v31 = vpop.permute.xlu2 %405  ;;  %v2112_v32 = vadd.f32 %v404_v30, %v389_v28 }
 0x5bc   :  { %v2114_v34 = vadd.f32 %v406_v31, %v390_v29 }
 0x5bd   :  { %1730 = vtanh.f32 %v2112_v32 }
 0x5be   :  { %1732 = vtanh.f32 %v2114_v34  ;;  %v502_v29 = vrot.slane %v2114_v34, 7 }
 0x5c3   :  { %v1731_v35 = vpop.eup %1730 }
 0x5c4   :  { %v1733_v36 = vpop.eup %1732  ;;  %415 = vrot.lane.b32.xlu0 %v1731_v35, %s2012_s13 }
 0x5c5   :  { %417 = vrot.lane.b32.xlu1 %v1733_v36, %s2012_s13 }
 0x636   :  { %v416_v33 = vpop.permute.xlu0 %415 }
 0x637   :  { %v418_v37 = vpop.permute.xlu1 %417  ;;  %v421_v38 = vmul.f32 %v416_v33, %v364_v12 }
 0x638   :  { %v422_v39 = vmul.f32 %v418_v37, %v379_v24  ;;  %v501_v24 = vrot.slane %v2112_v32, 7 }
 0x639   :  { %v425_v40 = vrot.slane %v421_v38, 2  ;;  %v1009_v41 = vrot.slane %v421_v38, 6 }
 0x63a   :  { %v426_v42 = vrot.slane %v422_v39, 1  ;;  %v1010_v43 = vrot.slane %v422_v39, 5 }
 0x63c   :  { %v427_v44 = vsel %vm191_vm9, %v426_v42, %v425_v40  ;;  %v1012_v45 = vsel %vm1011_vm14, %v1010_v43, %v1009_v41 }
 0x63d   :  { %428 = vrot.lane.b32.xlu2 %v427_v44, %s2013_s14  ;;  %v2127_v47 = vsel %vm1035_vm0, %v1034_v46, %v1012_v45  ;;  %v1045_v45 = vld [vmem:[#allocation7 + $0x18] sm:$0xff]  ;;  %v1044_v46 = vld [vmem:[#allocation7 + $0x10] sm:$0xff] }
 0x63e   :  { %1073 = vmatpush.msra.mxu1 %v1045_v45 }
 0x640   :  { %1074 = vmatpush.msra.mxu1 %v1044_v46 }
 0x697   :  { %v429_v49 = vpop.permute.xlu2 %428 }
 0x698   :  { %1642 = vmatmul.msk.f32.vlgmr.msra.gmra.mxu3 %vm195_vm10, %v429_v49  ;;  %v1043_v49 = vld [vmem:[#allocation7 + $0x8] sm:$0xff] }
 0x699   :  { %1075 = vmatpush.msra.mxu1 %v1043_v49 }
 0x71b   :  { %v449_v50 = vpop.f32.mrf.mxu3 }
 0x71c   :  { %v453_v51 = vrot.slane %v449_v50, 5  ;;  %v454_v52 = vrot.slane %v449_v50, 6  ;;  %v1042_v50 = vld [vmem:[#allocation7] sm:$0xff] }
 0x71d   :  { %1076 = vmatpush.msra.mxu1 %v1042_v50 }
 0x71e   :  { %v457_v54 = vadd.f32 %v453_v51, %v2063_v8  ;;  %v458_v55 = vadd.f32 %v454_v52, %v2060_v7 }
 0x720   :  { %1734 = vtanh.f32 %v457_v54  ;;  %v1643_v53 = vmul.f32 -1.442695, %v457_v54  ;;  %v1644_v48 = vmul.f32 -1.442695, %v458_v55 }
 0x721   :  { %1736 = vtanh.f32 %v458_v55 }
 0x722   :  { %1738 = vpow2.f32 %v1643_v53  ;;  %v2159_v53 = vld [vmem:[%s2357_s4 + $0x1] ss:$0 sm:$0xff]  ;;  %s2014_s4 = smov [#allocation10]  }
 0x723   :  { %1740 = vpow2.f32 %v1644_v48  ;;  %s1618_s17 = sshll.u32 %s2014_s4, 4  ;;  %s1619_s17 = int_to_ptr.vmem [resolvable:$true] %s1618_s17 }
 0x726   :  { %v1735_v56 = vpop.eup %1734 }
 0x727   :  { %v1737_v57 = vpop.eup %1736  ;;  %509 = vrot.lane.b32.xlu0 %v1735_v56, %s2012_s13 }
 0x728   :  { %511 = vrot.lane.b32.xlu1 %v1737_v57, %s2012_s13  ;;  %v1739_v58 = vpop.eup %1738 }
 0x729   :  { %v1741_v59 = vpop.eup %1740  ;;  %v465_v60 = vadd.f32 1.0, %v1739_v58 }
 0x72a   :  { %v466_v61 = vadd.f32 1.0, %v1741_v59 }
 0x72b   :  { %1742 = vrcp.f32 %v465_v60  ;;  %v478_v10 = vand.u32 2147483648, %v465_v60  ;;  %vm472_vm4 = vweird.f32 %v465_v60  ;;  %v476_v12 = vand.u32 2147483647, %v465_v60 }
 0x72c   :  { %1744 = vrcp.f32 %v466_v61  ;;  %v493_v11 = vand.u32 2147483648, %v466_v61  ;;  %vm487_vm5 = vweird.f32 %v466_v61  ;;  %v491_v13 = vand.u32 2147483647, %v466_v61 }
 0x72d   :  { %v479_v16 = vor.u32 1.1754944e-38, %v478_v10  ;;  %vm477_vm8 = vcmp.eq.f32.partialorder %v476_v12, 8.507059e+37 }
 0x72e   :  { %v494_v17 = vor.u32 1.1754944e-38, %v493_v11  ;;  %vm492_vm11 = vcmp.eq.f32.partialorder %v491_v13, 8.507059e+37 }
 0x731   :  { %v1743_v62 = vpop.eup %1742 }
 0x732   :  { %v1745_v63 = vpop.eup %1744  ;;  %v468_v0 = vmul.f32 %v1743_v62, %v465_v60  ;;  %vm473_vm1 = vweird.f32 %v1743_v62 }
 0x733   :  { %v483_v1 = vmul.f32 %v1745_v63, %v466_v61  ;;  %vm488_vm2 = vweird.f32 %v1745_v63  ;;  %vm474_vm6 = vmor %vm472_vm4, %vm473_vm1 }
 0x734   :  { %v469_v2 = vsub.f32 1.0, %v468_v0  ;;  %vm489_vm7 = vmor %vm487_vm5, %vm488_vm2 }
 0x735   :  { %v484_v3 = vsub.f32 1.0, %v483_v1 }
 0x736   :  { %v470_v4 = vmul.f32 %v1743_v62, %v469_v2 }
 0x737   :  { %v485_v5 = vmul.f32 %v1745_v63, %v484_v3 }
 0x738   :  { %v471_v6 = vadd.f32 %v1743_v62, %v470_v4 }
 0x739   :  { %v486_v9 = vadd.f32 %v1745_v63, %v485_v5 }
 0x73a   :  { %v475_v14 = vsel %vm474_vm6, %v1743_v62, %v471_v6 }
 0x73b   :  { %v490_v15 = vsel %vm489_vm7, %v1745_v63, %v486_v9  ;;  %v480_v19 = vsel %vm477_vm8, %v479_v16, %v475_v14 }
 0x73c   :  { %v495_v21 = vsel %vm492_vm11, %v494_v17, %v490_v15  ;;  %v505_v25 = vmul.f32 %v501_v24, %v480_v19 }
 0x73d   :  { %v506_v30 = vmul.f32 %v502_v29, %v495_v21 }
 0x799   :  { %v510_v18 = vpop.permute.xlu0 %509 }
 0x79a   :  { %v512_v20 = vpop.permute.xlu1 %511  ;;  %v515_v22 = vmul.f32 %v510_v18, %v480_v19 }
 0x79b   :  { %v516_v23 = vmul.f32 %v512_v20, %v495_v21 }
 0x79c   :  { %519 = vrot.lane.b32.xlu2 %v515_v22, %s2012_s13 }
 0x79d   :  { %521 = vrot.lane.b32.xlu0 %v516_v23, %s2012_s13 }
 0x7f6   :  { %v520_v26 = vpop.permute.xlu2 %519 }
 0x7f7   :  { %v2137_v27 = vadd.f32 %v520_v26, %v505_v25 }
 0x7f9   :  { %1746 = vtanh.f32 %v2137_v27  ;;  %v617_v50 = vrot.slane %v2137_v27, 7 }
 0x7ff   :  { %v1747_v28 = vpop.eup %1746 }
 0x800   :  { %531 = vrot.lane.b32.xlu1 %v1747_v28, %s2012_s13 }
 0x80f   :  { %v522_v31 = vpop.permute.xlu0 %521 }
 0x810   :  { %v2142_v35 = vadd.f32 %v522_v31, %v506_v30 }
 0x812   :  { %1748 = vtanh.f32 %v2142_v35 }
 0x818   :  { %v1749_v36 = vpop.eup %1748 }
 0x819   :  { %533 = vrot.lane.b32.xlu2 %v1749_v36, %s2012_s13 }
 0x872   :  { %v532_v32 = vpop.permute.xlu1 %531 }
 0x873   :  { %v534_v33 = vpop.permute.xlu2 %533  ;;  %v537_v37 = vmul.f32 %v532_v32, %v480_v19 }
 0x874   :  { %v538_v38 = vmul.f32 %v534_v33, %v495_v21 }
 0x875   :  { %v541_v39 = vrot.slane %v537_v37, 3  ;;  %v1014_v40 = vrot.slane %v537_v37, 5 }
 0x876   :  { %v542_v41 = vrot.slane %v538_v38, 2  ;;  %v1015_v42 = vrot.slane %v538_v38, 4 }
 0x878   :  { %v543_v34 = vsel %vm191_vm9, %v542_v41, %v541_v39  ;;  %v1017_v43 = vsel %vm2360_vm12, %v1015_v42, %v1014_v40 }
 0x879   :  { %544 = vrot.lane.b32.xlu0 %v543_v34, %s2013_s14  ;;  %v1038_v44 = vsel %vm2359_vm13, %v2127_v47, %v1017_v43 }
 0x87a   :  { %1053 = vrot.lane.b32.xlu1 %v1038_v44, %s2013_s14 }
 0x8eb   :  { %v545_v51 = vpop.permute.xlu0 %544 }
 0x8ec   :  { %1645 = vmatmul.msk.f32.vlgmr.msrb.gmra.mxu1 %vm195_vm10, %v545_v51  ;;  %v1054_v52 = vpop.permute.xlu1 %1053  ;;  %v618_v51 = vrot.slane %v2142_v35, 7 }
 0x8f4   :  { %1658 = vmatmul.msk.f32.vlgmr.msra.gmra.mxu1 %vm195_vm10, %v1054_v52 }
 0x969   :  { %v565_v54 = vpop.f32.mrf.mxu1 }
 0x96a   :  { %v569_v55 = vrot.slane %v565_v54, 4  ;;  %v570_v56 = vrot.slane %v565_v54, 5 }
 0x96c   :  { %v573_v47 = vadd.f32 %v569_v55, %v2063_v8  ;;  %v574_v57 = vadd.f32 %v570_v56, %v2060_v7 }
 0x96e   :  { %1750 = vtanh.f32 %v573_v47  ;;  %v1646_v62 = vmul.f32 -1.442695, %v573_v47  ;;  %v1647_v2 = vmul.f32 -1.442695, %v574_v57 }
 0x96f   :  { %1752 = vtanh.f32 %v574_v57 }
 0x971   :  { %v1078_v48 = vpop.f32.mrf.mxu1 }
 0x972   :  { %v2162_v58 = vadd.f32 %v2159_v53, %v1078_v48 }
 0x974   :  { %v1751_v59 = vpop.eup %1750  ;;  %1754 = vtanh.f32 %v2162_v58  ;;  %v1660_v5 = vmul.f32 -1.442695, %v2162_v58 }
 0x975   :  { %v1753_v60 = vpop.eup %1752  ;;  %625 = vrot.lane.b32.xlu2 %v1751_v59, %s2012_s13  ;;  %1756 = vpow2.f32 %v1646_v62 }
 0x976   :  { %627 = vrot.lane.b32.xlu0 %v1753_v60, %s2012_s13 }
 0x97a   :  { %v1755_v61 = vpop.eup %1754 }
 0x97b   :  { %v1757_v63 = vpop.eup %1756 }
 0x97c   :  { %v581_v0 = vadd.f32 1.0, %v1757_v63 }
 0x97e   :  { %1110 = vrot.lane.b32.xlu0 %v1755_v61, %s2012_s13  ;;  %1758 = vrcp.f32 %v581_v0  ;;  %v594_v12 = vand.u32 2147483648, %v581_v0  ;;  %vm588_vm2 = vweird.f32 %v581_v0  ;;  %v592_v13 = vand.u32 2147483647, %v581_v0 }
 0x97f   :  { %1760 = vpow2.f32 %v1647_v2 }
 0x980   :  { %1762 = vpow2.f32 %v1660_v5  ;;  %v595_v16 = vor.u32 1.1754944e-38, %v594_v12  ;;  %vm593_vm5 = vcmp.eq.f32.partialorder %v592_v13, 8.507059e+37  ;;  %v2197_v5 = vld [vmem:[#allocation8 + $0x28] sm:$0xff] }
 0x984   :  { %v1759_v1 = vpop.eup %1758 }
 0x985   :  { %v584_v3 = vmul.f32 %v1759_v1, %v581_v0  ;;  %v1761_v9 = vpop.eup %1760  ;;  %vm589_vm1 = vweird.f32 %v1759_v1 }
 0x986   :  { %v582_v10 = vadd.f32 1.0, %v1761_v9  ;;  %vm590_vm4 = vmor %vm588_vm2, %vm589_vm1  ;;  %v1763_v15 = vpop.eup %1762 }
 0x987   :  { %v585_v4 = vsub.f32 1.0, %v584_v3  ;;  %v1092_v19 = vadd.f32 1.0, %v1763_v15  ;;  %v2191_v3 = vld [vmem:[#allocation8 + $0x38] sm:$0xff] }
 0x988   :  { %1764 = vrcp.f32 %v582_v10  ;;  %v609_v30 = vand.u32 2147483648, %v582_v10  ;;  %vm603_vm7 = vweird.f32 %v582_v10  ;;  %v607_v31 = vand.u32 2147483647, %v582_v10  ;;  %1137 = vmatpush.msra.mxu2 %v2191_v3  ;;  %1209 = vmatpush.msra.mxu3 %v2191_v3 }
 0x989   :  { %v586_v6 = vmul.f32 %v1759_v1, %v585_v4  ;;  %1766 = vrcp.f32 %v1092_v19  ;;  %v1104_v41 = vand.u32 2147483648, %v1092_v19  ;;  %vm1098_vm2 = vweird.f32 %v1092_v19  ;;  %v2193_v4 = vld [vmem:[#allocation8 + $0x30] sm:$0xff]  ;;  %1279 = vmatpush.msra.mxu0 %v2191_v3  ;;  %1555 = vmatpush.msrb.mxu1 %v2191_v3 }
 0x98a   :  { %v610_v33 = vor.u32 1.1754944e-38, %v609_v30  ;;  %vm608_vm11 = vcmp.eq.f32.partialorder %v607_v31, 8.507059e+37  ;;  %v1102_v42 = vand.u32 2147483647, %v1092_v19  ;;  %1138 = vmatpush.msra.mxu2 %v2193_v4  ;;  %1210 = vmatpush.msra.mxu3 %v2193_v4 }
 0x98b   :  { %v587_v11 = vadd.f32 %v1759_v1, %v586_v6  ;;  %v1105_v43 = vor.u32 1.1754944e-38, %v1104_v41  ;;  %v2203_v6 = vld [vmem:[#allocation8 + $0x20] sm:$0xff]  ;;  %1280 = vmatpush.msra.mxu0 %v2193_v4  ;;  %1556 = vmatpush.msrb.mxu1 %v2193_v4 }
 0x98c   :  { %1139 = vmatpush.msra.mxu2 %v2197_v5  ;;  %1211 = vmatpush.msra.mxu3 %v2197_v5 }
 0x98d   :  { %v591_v14 = vsel %vm590_vm4, %v1759_v1, %v587_v11  ;;  %1281 = vmatpush.msra.mxu0 %v2197_v5  ;;  %1557 = vmatpush.msrb.mxu1 %v2197_v5 }
 0x98e   :  { %v596_v18 = vsel %vm593_vm5, %v595_v16, %v591_v14  ;;  %v1765_v21 = vpop.eup %1764  ;;  %vm1103_vm5 = vcmp.eq.f32.partialorder %v1102_v42, 8.507059e+37  ;;  %1140 = vmatpush.msra.mxu2 %v2203_v6  ;;  %1212 = vmatpush.msra.mxu3 %v2203_v6 }
 0x98f   :  { %v599_v22 = vmul.f32 %v1765_v21, %v582_v10  ;;  %v1767_v24 = vpop.eup %1766  ;;  %vm604_vm6 = vweird.f32 %v1765_v21  ;;  %v621_v52 = vmul.f32 %v617_v50, %v596_v18  ;;  %1282 = vmatpush.msra.mxu0 %v2203_v6  ;;  %1558 = vmatpush.msrb.mxu1 %v2203_v6 }
 0x990   :  { %v1094_v26 = vmul.f32 %v1767_v24, %v1092_v19  ;;  %vm605_vm8 = vmor %vm603_vm7, %vm604_vm6  ;;  %vm1099_vm1 = vweird.f32 %v1767_v24 }
 0x991   :  { %v600_v23 = vsub.f32 1.0, %v599_v22  ;;  %vm1100_vm4 = vmor %vm1098_vm2, %vm1099_vm1 }
 0x992   :  { %v1095_v29 = vsub.f32 1.0, %v1094_v26 }
 0x993   :  { %v601_v25 = vmul.f32 %v1765_v21, %v600_v23 }
 0x994   :  { %v1096_v32 = vmul.f32 %v1767_v24, %v1095_v29 }
 0x995   :  { %v602_v28 = vadd.f32 %v1765_v21, %v601_v25 }
 0x996   :  { %v1097_v40 = vadd.f32 %v1767_v24, %v1096_v32 }
 0x997   :  { %v606_v36 = vsel %vm605_vm8, %v1765_v21, %v602_v28 }
 0x998   :  { %v611_v38 = vsel %vm608_vm11, %v610_v33, %v606_v36  ;;  %v1101_v34 = vsel %vm1100_vm4, %v1767_v24, %v1097_v40 }
 0x999   :  { %v1106_v44 = vsel %vm1103_vm5, %v1105_v43, %v1101_v34  ;;  %v622_v54 = vmul.f32 %v618_v51, %v611_v38 }
 0x9cf   :  { %v626_v17 = vpop.permute.xlu2 %625 }
 0x9d0   :  { %v631_v20 = vmul.f32 %v626_v17, %v596_v18 }
 0x9d2   :  { %635 = vrot.lane.b32.xlu1 %v631_v20, %s2012_s13 }
 0x9e8   :  { %v628_v37 = vpop.permute.xlu0 %627 }
 0x9e9   :  { %v632_v39 = vmul.f32 %v628_v37, %v611_v38 }
 0x9eb   :  { %637 = vrot.lane.b32.xlu2 %v632_v39, %s2012_s13 }
 0x9f0   :  { %v1111_v45 = vpop.permute.xlu0 %1110 }
 0x9f1   :  { %v2171_v46 = vmul.f32 %v1111_v45, %v1106_v44 }
 0x9f3   :  { %1768 = vtanh.f32 %v2171_v46  ;;  %v1170_v22 = vrot.slane %v2171_v46, 6 }
 0x9f9   :  { %v1769_v49 = vpop.eup %1768 }
 0x9fa   :  { %1116 = vrot.lane.b32.xlu0 %v1769_v49, %s2013_s14 }
 0xa44   :  { %v636_v55 = vpop.permute.xlu1 %635 }
 0xa45   :  { %v638_v56 = vpop.permute.xlu2 %637  ;;  %v2177_v47 = vadd.f32 %v636_v55, %v621_v52 }
 0xa46   :  { %v2179_v57 = vadd.f32 %v638_v56, %v622_v54 }
 0xa47   :  { %1770 = vtanh.f32 %v2177_v47 }
 0xa48   :  { %1772 = vtanh.f32 %v2179_v57 }
 0xa4d   :  { %v1771_v48 = vpop.eup %1770 }
 0xa4e   :  { %v1773_v59 = vpop.eup %1772  ;;  %647 = vrot.lane.b32.xlu1 %v1771_v48, %s2012_s13 }
 0xa4f   :  { %649 = vrot.lane.b32.xlu2 %v1773_v59, %s2012_s13 }
 0xa6c   :  { %v1117_v27 = vpop.permute.xlu0 %1116 }
 0xa6d   :  { %v1119_v35 = vmul.f32 %v1117_v27, %v1106_v44 }
 0xa6f   :  { %1121 = vrot.lane.b32.xlu2 %v1119_v35, %s2013_s14 }
 0xaa9   :  { %v650_v60 = vpop.permute.xlu2 %649 }
 0xaaa   :  { %v654_v61 = vmul.f32 %v650_v60, %v611_v38 }
 0xaac   :  { %v658_v0 = vrot.slane %v654_v61, 3 }
 0xac0   :  { %v648_v62 = vpop.permute.xlu1 %647 }
 0xac1   :  { %v653_v63 = vmul.f32 %v648_v62, %v596_v18 }
 0xac3   :  { %v657_v1 = vrot.slane %v653_v63, 4 }
 0xac5   :  { %v2187_v2 = vsel %vm191_vm9, %v658_v0, %v657_v1 }
 0xac6   :  { %660 = vrot.lane.b32.xlu1 %v2187_v2, %s2013_s14 }
 0xac9   :  { %v1122_v10 = vpop.permute.xlu2 %1121 }
 0xb38   :  { %v661_v9 = vpop.permute.xlu1 %660 }
 0xb39   :  { %1648 = vmatmul.msk.f32.vlgmr.msrb.gmra.mxu2 %vm195_vm10, %v661_v9 }
 0xb3a   :  { %1349 = vmatpush.msrb.mxu2 %v2191_v3 }
 0xb3c   :  { %1350 = vmatpush.msrb.mxu2 %v2193_v4 }
 0xb3e   :  { %1351 = vmatpush.msrb.mxu2 %v2197_v5 }
 0xb40   :  { %1352 = vmatpush.msrb.mxu2 %v2203_v6 }
 0xb41   :  { %1661 = vmatmul.msk.f32.vlgmr.msra.gmra.mxu2 %vm195_vm10, %v1122_v10 }
 0xbbc   :  { %v681_v11 = vpop.f32.mrf.mxu2 }
 0xbbd   :  { %v685_v12 = vrot.slane %v681_v11, 3  ;;  %v686_v13 = vrot.slane %v681_v11, 4 }
 0xbbf   :  { %v689_v14 = vadd.f32 %v685_v12, %v2063_v8  ;;  %v690_v15 = vadd.f32 %v686_v13, %v2060_v7 }
 0xbc1   :  { %1774 = vtanh.f32 %v689_v14  ;;  %v1649_v23 = vmul.f32 -1.442695, %v689_v14  ;;  %v1650_v24 = vmul.f32 -1.442695, %v690_v15 }
 0xbc2   :  { %1776 = vtanh.f32 %v690_v15  ;;  %v733_v15 = vrot.slane %v2177_v47, 7 }
 0xbc4   :  { %v1142_v16 = vpop.f32.mrf.mxu2 }
 0xbc5   :  { %v1146_v17 = vrot.slane %v1142_v16, 6  ;;  %v734_v16 = vrot.slane %v2179_v57, 7 }
 0xbc7   :  { %v1775_v18 = vpop.eup %1774  ;;  %v1148_v19 = vadd.f32 %v1146_v17, %v2162_v58 }
 0xbc8   :  { %v1777_v20 = vpop.eup %1776  ;;  %741 = vrot.lane.b32.xlu0 %v1775_v18, %s2012_s13 }
 0xbc9   :  { %1778 = vtanh.f32 %v1148_v19  ;;  %743 = vrot.lane.b32.xlu1 %v1777_v20, %s2012_s13  ;;  %v1662_v25 = vmul.f32 -1.442695, %v1148_v19 }
 0xbca   :  { %1780 = vpow2.f32 %v1649_v23 }
 0xbcb   :  { %1782 = vpow2.f32 %v1650_v24 }
 0xbcc   :  { %1784 = vpow2.f32 %v1662_v25 }
 0xbcf   :  { %v1779_v21 = vpop.eup %1778 }
 0xbd0   :  { %1176 = vrot.lane.b32.xlu2 %v1779_v21, %s2012_s13  ;;  %v1781_v26 = vpop.eup %1780 }
 0xbd1   :  { %v1783_v28 = vpop.eup %1782  ;;  %v697_v29 = vadd.f32 1.0, %v1781_v26 }
 0xbd2   :  { %v698_v30 = vadd.f32 1.0, %v1783_v28  ;;  %v1785_v31 = vpop.eup %1784 }
 0xbd3   :  { %1786 = vrcp.f32 %v697_v29  ;;  %v1152_v36 = vadd.f32 1.0, %v1785_v31  ;;  %v710_v49 = vand.u32 2147483648, %v697_v29  ;;  %vm704_vm8 = vweird.f32 %v697_v29 }
 0xbd4   :  { %1788 = vrcp.f32 %v698_v30  ;;  %v725_v50 = vand.u32 2147483648, %v698_v30  ;;  %v708_v51 = vand.u32 2147483647, %v697_v29  ;;  %vm719_vm11 = vweird.f32 %v698_v30 }
 0xbd5   :  { %1790 = vrcp.f32 %v1152_v36  ;;  %v723_v52 = vand.u32 2147483647, %v698_v30  ;;  %v711_v48 = vor.u32 1.1754944e-38, %v710_v49  ;;  %v1164_v0 = vand.u32 2147483648, %v1152_v36 }
 0xbd6   :  { %v726_v59 = vor.u32 1.1754944e-38, %v725_v50  ;;  %vm709_vm4 = vcmp.eq.f32.partialorder %v708_v51, 8.507059e+37  ;;  %vm1158_vm12 = vweird.f32 %v1152_v36  ;;  %v1162_v9 = vand.u32 2147483647, %v1152_v36 }
 0xbd7   :  { %vm724_vm5 = vcmp.eq.f32.partialorder %v723_v52, 8.507059e+37  ;;  %v1165_v12 = vor.u32 1.1754944e-38, %v1164_v0 }
 0xbd8   :  { %1171 = vrot.lane.b32.xlu2 %v1170_v22, %s2012_s13 }
 0xbd9   :  { %v1787_v32 = vpop.eup %1786 }
 0xbda   :  { %v1789_v33 = vpop.eup %1788  ;;  %v700_v37 = vmul.f32 %v1787_v32, %v697_v29  ;;  %vm705_vm6 = vweird.f32 %v1787_v32 }
 0xbdb   :  { %v715_v38 = vmul.f32 %v1789_v33, %v698_v30  ;;  %v1791_v40 = vpop.eup %1790  ;;  %vm720_vm7 = vweird.f32 %v1789_v33  ;;  %vm706_vm1 = vmor %vm704_vm8, %vm705_vm6 }
 0xbdc   :  { %v701_v39 = vsub.f32 1.0, %v700_v37  ;;  %v1154_v42 = vmul.f32 %v1791_v40, %v1152_v36  ;;  %vm721_vm2 = vmor %vm719_vm11, %vm720_vm7  ;;  %vm1159_vm13 = vweird.f32 %v1791_v40  ;;  %vm1163_vm7 = vcmp.eq.f32.partialorder %v1162_v9, 8.507059e+37 }
 0xbdd   :  { %v716_v41 = vsub.f32 1.0, %v715_v38  ;;  %vm1160_vm6 = vmor %vm1158_vm12, %vm1159_vm13 }
 0xbde   :  { %v702_v34 = vmul.f32 %v1787_v32, %v701_v39  ;;  %v1155_v44 = vsub.f32 1.0, %v1154_v42 }
 0xbdf   :  { %v717_v43 = vmul.f32 %v1789_v33, %v716_v41 }
 0xbe0   :  { %v703_v45 = vadd.f32 %v1787_v32, %v702_v34  ;;  %v1156_v54 = vmul.f32 %v1791_v40, %v1155_v44 }
 0xbe1   :  { %v718_v46 = vadd.f32 %v1789_v33, %v717_v43 }
 0xbe2   :  { %v707_v55 = vsel %vm706_vm1, %v1787_v32, %v703_v45  ;;  %v1157_v60 = vadd.f32 %v1791_v40, %v1156_v54 }
 0xbe3   :  { %v722_v56 = vsel %vm721_vm2, %v1789_v33, %v718_v46  ;;  %v712_v35 = vsel %vm709_vm4, %v711_v48, %v707_v55 }
 0xbe4   :  { %v727_v62 = vsel %vm724_vm5, %v726_v59, %v722_v56  ;;  %v1161_v10 = vsel %vm1160_vm6, %v1791_v40, %v1157_v60  ;;  %v737_v17 = vmul.f32 %v733_v15, %v712_v35 }
 0xbe5   :  { %v1166_v13 = vsel %vm1163_vm7, %v1165_v12, %v1161_v10  ;;  %v738_v18 = vmul.f32 %v734_v16, %v727_v62 }
 0xc2a   :  { %v1177_v11 = vpop.permute.xlu2 %1176 }
 0xc2b   :  { %v1179_v14 = vmul.f32 %v1177_v11, %v1166_v13 }
 0xc32   :  { %v1172_v23 = vpop.permute.xlu2 %1171 }
 0xc33   :  { %v1174_v24 = vmul.f32 %v1172_v23, %v1166_v13 }
 0xc3a   :  { %v742_v27 = vpop.permute.xlu0 %741 }
 0xc3b   :  { %v744_v61 = vpop.permute.xlu1 %743  ;;  %v747_v63 = vmul.f32 %v742_v27, %v712_v35 }
 0xc3c   :  { %v748_v1 = vmul.f32 %v744_v61, %v727_v62 }
 0xc3d   :  { %751 = vrot.lane.b32.xlu0 %v747_v63, %s2012_s13 }
 0xc3e   :  { %753 = vrot.lane.b32.xlu1 %v748_v1, %s2012_s13 }
 0xc45   :  { %1181 = vrot.lane.b32.xlu0 %v1179_v14, %s2012_s13 }
 0xcaf   :  { %v752_v19 = vpop.permute.xlu0 %751 }
 0xcb0   :  { %v754_v20 = vpop.permute.xlu1 %753  ;;  %v2234_v21 = vadd.f32 %v752_v19, %v737_v17 }
 0xcb1   :  { %v2236_v22 = vadd.f32 %v754_v20, %v738_v18 }
 0xcb2   :  { %1792 = vtanh.f32 %v2234_v21 }
 0xcb3   :  { %1794 = vtanh.f32 %v2236_v22 }
 0xcb7   :  { %v1182_v25 = vpop.permute.xlu0 %1181 }
 0xcb8   :  { %v1793_v26 = vpop.eup %1792  ;;  %v2240_v28 = vadd.f32 %v1182_v25, %v1174_v24 }
 0xcb9   :  { %v1795_v47 = vpop.eup %1794  ;;  %763 = vrot.lane.b32.xlu1 %v1793_v26, %s2012_s13 }
 0xcba   :  { %1796 = vtanh.f32 %v2240_v28  ;;  %765 = vrot.lane.b32.xlu2 %v1795_v47, %s2012_s13 }
 0xcc0   :  { %v1797_v57 = vpop.eup %1796 }
 0xcc1   :  { %1187 = vrot.lane.b32.xlu0 %v1797_v57, %s2012_s13 }
 0xd14   :  { %v766_v29 = vpop.permute.xlu2 %765 }
 0xd15   :  { %v770_v30 = vmul.f32 %v766_v29, %v727_v62 }
 0xd17   :  { %v774_v32 = vrot.slane %v770_v30, 4  ;;  %v1021_v33 = vrot.slane %v770_v30, 2 }
 0xd2b   :  { %v764_v31 = vpop.permute.xlu1 %763 }
 0xd2c   :  { %v769_v36 = vmul.f32 %v764_v31, %v712_v35 }
 0xd2e   :  { %v773_v37 = vrot.slane %v769_v36, 5  ;;  %v1020_v38 = vrot.slane %v769_v36, 3 }
 0xd30   :  { %v2247_v39 = vsel %vm1006_vm3, %v1021_v33, %v1020_v38  ;;  %v775_v40 = vsel %vm191_vm9, %v774_v32, %v773_v37 }
 0xd31   :  { %776 = vrot.lane.b32.xlu1 %v775_v40, %s2013_s14 }
 0xd33   :  { %v1188_v41 = vpop.permute.xlu0 %1187 }
 0xd34   :  { %v1190_v42 = vmul.f32 %v1188_v41, %v1166_v13 }
 0xd36   :  { %v1192_v34 = vrot.slane %v1190_v42, 2 }
 0xd38   :  { %1193 = vrot.lane.b32.xlu2 %v1192_v34, %s2013_s14 }
 0xd92   :  { %v1194_v44 = vpop.permute.xlu2 %1193 }
 0xda3   :  { %v777_v43 = vpop.permute.xlu1 %776 }
 0xda4   :  { %1651 = vmatmul.msk.f32.vlgmr.msrb.gmra.mxu3 %vm195_vm10, %v777_v43 }
 0xda5   :  { %1415 = vmatpush.msrb.mxu3 %v2191_v3 }
 0xda7   :  { %1416 = vmatpush.msrb.mxu3 %v2193_v4 }
 0xda9   :  { %1417 = vmatpush.msrb.mxu3 %v2197_v5 }
 0xdab   :  { %1418 = vmatpush.msrb.mxu3 %v2203_v6 }
 0xdac   :  { %1663 = vmatmul.msk.f32.vlgmr.msra.gmra.mxu3 %vm195_vm10, %v1194_v44 }
 0xe27   :  { %v797_v45 = vpop.f32.mrf.mxu3 }
 0xe28   :  { %v801_v46 = vrot.slane %v797_v45, 2  ;;  %v802_v49 = vrot.slane %v797_v45, 3 }
 0xe2a   :  { %v805_v50 = vadd.f32 %v801_v46, %v2063_v8  ;;  %v806_v51 = vadd.f32 %v802_v49, %v2060_v7 }
 0xe2c   :  { %1798 = vtanh.f32 %v805_v50  ;;  %v1652_v61 = vmul.f32 -1.442695, %v805_v50  ;;  %v1653_v62 = vmul.f32 -1.442695, %v806_v51 }
 0xe2d   :  { %1800 = vtanh.f32 %v806_v51 }
 0xe2f   :  { %v1214_v52 = vpop.f32.mrf.mxu3 }
 0xe30   :  { %v1218_v54 = vrot.slane %v1214_v52, 4  ;;  %v1242_v52 = vrot.slane %v2240_v28, 6 }
 0xe32   :  { %v1799_v55 = vpop.eup %1798  ;;  %v1220_v56 = vadd.f32 %v1218_v54, %v2162_v58 }
 0xe33   :  { %v1801_v48 = vpop.eup %1800  ;;  %857 = vrot.lane.b32.xlu0 %v1799_v55, %s2012_s13 }
 0xe34   :  { %1802 = vtanh.f32 %v1220_v56  ;;  %859 = vrot.lane.b32.xlu1 %v1801_v48, %s2012_s13  ;;  %v1664_v27 = vmul.f32 -1.442695, %v1220_v56 }
 0xe36   :  { %1804 = vpow2.f32 %v1664_v27  ;;  %v850_v27 = vrot.slane %v2236_v22, 7 }
 0xe3a   :  { %v1803_v59 = vpop.eup %1802 }
 0xe3b   :  { %1246 = vrot.lane.b32.xlu2 %v1803_v59, %s2012_s13  ;;  %v849_v59 = vrot.slane %v2234_v21, 7 }
 0xe3c   :  { %v1805_v35 = vpop.eup %1804 }
 0xe3d   :  { %v1224_v60 = vadd.f32 1.0, %v1805_v35 }
 0xe3f   :  { %1806 = vrcp.f32 %v1224_v60  ;;  %v1236_v16 = vand.u32 2147483648, %v1224_v60  ;;  %vm1230_vm12 = vweird.f32 %v1224_v60  ;;  %v1234_v18 = vand.u32 2147483647, %v1224_v60 }
 0xe40   :  { %1808 = vpow2.f32 %v1652_v61 }
 0xe41   :  { %1810 = vpow2.f32 %v1653_v62  ;;  %v1237_v23 = vor.u32 1.1754944e-38, %v1236_v16  ;;  %vm1235_vm8 = vcmp.eq.f32.partialorder %v1234_v18, 8.507059e+37 }
 0xe45   :  { %v1807_v63 = vpop.eup %1806 }
 0xe46   :  { %v1809_v0 = vpop.eup %1808  ;;  %v1226_v1 = vmul.f32 %v1807_v63, %v1224_v60  ;;  %vm1231_vm3 = vweird.f32 %v1807_v63 }
 0xe47   :  { %v1811_v9 = vpop.eup %1810  ;;  %v813_v10 = vadd.f32 1.0, %v1809_v0  ;;  %vm1232_vm13 = vmor %vm1230_vm12, %vm1231_vm3 }
 0xe48   :  { %v814_v11 = vadd.f32 1.0, %v1811_v9  ;;  %v1227_v12 = vsub.f32 1.0, %v1226_v1 }
 0xe49   :  { %1812 = vrcp.f32 %v813_v10  ;;  %v826_v33 = vand.u32 2147483648, %v813_v10  ;;  %vm820_vm2 = vweird.f32 %v813_v10  ;;  %v824_v38 = vand.u32 2147483647, %v813_v10 }
 0xe4a   :  { %1814 = vrcp.f32 %v814_v11  ;;  %v1228_v13 = vmul.f32 %v1807_v63, %v1227_v12  ;;  %v841_v37 = vand.u32 2147483648, %v814_v11  ;;  %vm835_vm4 = vweird.f32 %v814_v11 }
 0xe4b   :  { %v839_v40 = vand.u32 2147483647, %v814_v11  ;;  %v827_v34 = vor.u32 1.1754944e-38, %v826_v33  ;;  %vm825_vm7 = vcmp.eq.f32.partialorder %v824_v38, 8.507059e+37 }
 0xe4c   :  { %v1229_v14 = vadd.f32 %v1807_v63, %v1228_v13  ;;  %v842_v43 = vor.u32 1.1754944e-38, %v841_v37 }
 0xe4d   :  { %vm840_vm3 = vcmp.eq.f32.partialorder %v839_v40, 8.507059e+37 }
 0xe4e   :  { %v1233_v19 = vsel %vm1232_vm13, %v1807_v63, %v1229_v14 }
 0xe4f   :  { %v1813_v15 = vpop.eup %1812  ;;  %v1238_v26 = vsel %vm1235_vm8, %v1237_v23, %v1233_v19 }
 0xe50   :  { %v1815_v17 = vpop.eup %1814  ;;  %v816_v20 = vmul.f32 %v1813_v15, %v813_v10  ;;  %vm821_vm11 = vweird.f32 %v1813_v15  ;;  %v1244_v54 = vmul.f32 %v1242_v52, %v1238_v26 }
 0xe51   :  { %v831_v24 = vmul.f32 %v1815_v17, %v814_v11  ;;  %vm836_vm1 = vweird.f32 %v1815_v17  ;;  %vm822_vm5 = vmor %vm820_vm2, %vm821_vm11 }
 0xe52   :  { %v817_v57 = vsub.f32 1.0, %v816_v20  ;;  %vm837_vm6 = vmor %vm835_vm4, %vm836_vm1  ;;  %v1039_v20 = vsel %vm1033_vm15, %v2187_v2, %v2247_v39 }
 0xe53   :  { %v832_v29 = vsub.f32 1.0, %v831_v24 }
 0xe54   :  { %v818_v30 = vmul.f32 %v1813_v15, %v817_v57 }
 0xe55   :  { %v833_v31 = vmul.f32 %v1815_v17, %v832_v29 }
 0xe56   :  { %v819_v36 = vadd.f32 %v1813_v15, %v818_v30 }
 0xe57   :  { %v834_v32 = vadd.f32 %v1815_v17, %v833_v31 }
 0xe58   :  { %v823_v41 = vsel %vm822_vm5, %v1813_v15, %v819_v36 }
 0xe59   :  { %v838_v42 = vsel %vm837_vm6, %v1815_v17, %v834_v32  ;;  %v828_v45 = vsel %vm825_vm7, %v827_v34, %v823_v41  ;;  %vm2361_vm6 = vcmask 1047559   ;;  %vm2362_vm7 = vcmask 1045504  }
 0xe5a   :  { %v843_v49 = vsel %vm840_vm3, %v842_v43, %v838_v42  ;;  %v853_v35 = vmul.f32 %v849_v59, %v828_v45 }
 0xe5b   :  { %v854_v60 = vmul.f32 %v850_v27, %v843_v49 }
 0xe95   :  { %v1247_v25 = vpop.permute.xlu2 %1246 }
 0xe96   :  { %v1249_v47 = vmul.f32 %v1247_v25, %v1238_v26 }
 0xe98   :  { %1251 = vrot.lane.b32.xlu2 %v1249_v47, %s2012_s13 }
 0xea5   :  { %v858_v44 = vpop.permute.xlu0 %857 }
 0xea6   :  { %v860_v46 = vpop.permute.xlu1 %859  ;;  %v863_v50 = vmul.f32 %v858_v44, %v828_v45 }
 0xea7   :  { %v864_v51 = vmul.f32 %v860_v46, %v843_v49 }
 0xea8   :  { %867 = vrot.lane.b32.xlu0 %v863_v50, %s2012_s13 }
 0xea9   :  { %869 = vrot.lane.b32.xlu1 %v864_v51, %s2012_s13 }
 0xef2   :  { %v1252_v55 = vpop.permute.xlu2 %1251 }
 0xef3   :  { %v2268_v56 = vadd.f32 %v1252_v55, %v1244_v54 }
 0xef5   :  { %1816 = vtanh.f32 %v2268_v56 }
 0xefb   :  { %v1817_v48 = vpop.eup %1816 }
 0xefc   :  { %1257 = vrot.lane.b32.xlu2 %v1817_v48, %s2012_s13 }
 0xf1a   :  { %v868_v61 = vpop.permute.xlu0 %867 }
 0xf1b   :  { %v870_v62 = vpop.permute.xlu1 %869  ;;  %v2274_v63 = vadd.f32 %v868_v61, %v853_v35 }
 0xf1c   :  { %v2276_v28 = vadd.f32 %v870_v62, %v854_v60 }
 0xf1d   :  { %1818 = vtanh.f32 %v2274_v63 }
 0xf1e   :  { %1820 = vtanh.f32 %v2276_v28 }
 0xf23   :  { %v1819_v0 = vpop.eup %1818 }
 0xf24   :  { %v1821_v1 = vpop.eup %1820  ;;  %879 = vrot.lane.b32.xlu0 %v1819_v0, %s2012_s13 }
 0xf25   :  { %881 = vrot.lane.b32.xlu1 %v1821_v1, %s2012_s13 }
 0xf56   :  { %v1258_v21 = vpop.permute.xlu2 %1257 }
 0xf57   :  { %v1260_v22 = vmul.f32 %v1258_v21, %v1238_v26 }
 0xf59   :  { %v1262_v9 = vrot.slane %v1260_v22, 4 }
 0xf5b   :  { %1263 = vrot.lane.b32.xlu1 %v1262_v9, %s2013_s14 }
 0xf96   :  { %v880_v10 = vpop.permute.xlu0 %879 }
 0xf97   :  { %v882_v11 = vpop.permute.xlu1 %881  ;;  %v885_v12 = vmul.f32 %v880_v10, %v828_v45 }
 0xf98   :  { %v886_v13 = vmul.f32 %v882_v11, %v843_v49 }
 0xf99   :  { %v889_v14 = vrot.slane %v885_v12, 6  ;;  %v1024_v15 = vrot.slane %v885_v12, 2 }
 0xf9a   :  { %v890_v16 = vrot.slane %v886_v13, 5  ;;  %v1025_v17 = vrot.slane %v886_v13, 1 }
 0xf9c   :  { %v891_v18 = vsel %vm191_vm9, %v890_v16, %v889_v14  ;;  %v1026_v19 = vsel %vm1011_vm14, %v1025_v17, %v1024_v15 }
 0xf9d   :  { %892 = vrot.lane.b32.xlu0 %v891_v18, %s2013_s14  ;;  %v2290_v23 = vsel %vm1035_vm0, %v1039_v20, %v1026_v19  ;;  %v1312_v20 = vrot.slane %v2268_v56, 6 }
 0xfcd   :  { %v1264_v25 = vpop.permute.xlu1 %1263 }
0x100f   :  { %v893_v24 = vpop.permute.xlu0 %892 }
0x1010   :  { %1654 = vmatmul.msk.f32.vlgmr.msrb.gmra.mxu0 %vm195_vm10, %v893_v24 }
0x1011   :  { %1485 = vmatpush.msrb.mxu0 %v2191_v3 }
0x1013   :  { %1486 = vmatpush.msrb.mxu0 %v2193_v4 }
0x1015   :  { %1487 = vmatpush.msrb.mxu0 %v2197_v5 }
0x1017   :  { %1488 = vmatpush.msrb.mxu0 %v2203_v6 }
0x1018   :  { %1665 = vmatmul.msk.f32.vlgmr.msra.gmra.mxu0 %vm195_vm10, %v1264_v25 }
0x108d   :  { %v913_v2 = vpop.f32.mrf.mxu0 }
0x108e   :  { %v917_v39 = vrot.slane %v913_v2, 1  ;;  %v918_v26 = vrot.slane %v913_v2, 2 }
0x1090   :  { %v921_v47 = vadd.f32 %v917_v39, %v2063_v8  ;;  %v922_v57 = vadd.f32 %v918_v26, %v2060_v7  ;;  %v965_v26 = vrot.slane %v2274_v63, 7 }
0x1092   :  { %1822 = vtanh.f32 %v921_v47  ;;  %v1655_v36 = vmul.f32 -1.442695, %v921_v47  ;;  %v1656_v32 = vmul.f32 -1.442695, %v922_v57  ;;  %v966_v47 = vrot.slane %v2276_v28, 7 }
0x1093   :  { %1824 = vtanh.f32 %v922_v57 }
0x1095   :  { %v1284_v29 = vpop.f32.mrf.mxu0 }
0x1096   :  { %v1288_v3 = vrot.slane %v1284_v29, 2 }
0x1098   :  { %v1823_v30 = vpop.eup %1822  ;;  %v1290_v4 = vadd.f32 %v1288_v3, %v2162_v58 }
0x1099   :  { %v1825_v5 = vpop.eup %1824  ;;  %973 = vrot.lane.b32.xlu0 %v1823_v30, %s2012_s13 }
0x109a   :  { %1826 = vtanh.f32 %v1290_v4  ;;  %975 = vrot.lane.b32.xlu1 %v1825_v5, %s2012_s13  ;;  %v1666_v31 = vmul.f32 -1.442695, %v1290_v4 }
0x109c   :  { %1828 = vpow2.f32 %v1666_v31 }
0x10a0   :  { %v1827_v6 = vpop.eup %1826 }
0x10a1   :  { %1316 = vrot.lane.b32.xlu2 %v1827_v6, %s2012_s13 }
0x10a2   :  { %v1829_v8 = vpop.eup %1828 }
0x10a3   :  { %v1294_v7 = vadd.f32 1.0, %v1829_v8 }
0x10a5   :  { %1830 = vrcp.f32 %v1294_v7  ;;  %v1306_v45 = vand.u32 2147483648, %v1294_v7  ;;  %vm1300_vm14 = vweird.f32 %v1294_v7  ;;  %v1304_v49 = vand.u32 2147483647, %v1294_v7 }
0x10a6   :  { %1832 = vpow2.f32 %v1655_v36 }
0x10a7   :  { %1834 = vpow2.f32 %v1656_v32  ;;  %v1307_v52 = vor.u32 1.1754944e-38, %v1306_v45  ;;  %vm1305_vm0 = vcmp.eq.f32.partialorder %v1304_v49, 8.507059e+37 }
0x10ab   :  { %v1831_v33 = vpop.eup %1830 }
0x10ac   :  { %v1833_v58 = vpop.eup %1832  ;;  %v1296_v37 = vmul.f32 %v1831_v33, %v1294_v7  ;;  %vm1301_vm9 = vweird.f32 %v1831_v33 }
0x10ad   :  { %v1835_v38 = vpop.eup %1834  ;;  %v929_v40 = vadd.f32 1.0, %v1833_v58  ;;  %vm1302_vm15 = vmor %vm1300_vm14, %vm1301_vm9 }
0x10ae   :  { %v930_v41 = vadd.f32 1.0, %v1835_v38  ;;  %v1297_v42 = vsub.f32 1.0, %v1296_v37 }
0x10af   :  { %1836 = vrcp.f32 %v929_v40  ;;  %v942_v1 = vand.u32 2147483648, %v929_v40  ;;  %vm936_vm8 = vweird.f32 %v929_v40  ;;  %v940_v22 = vand.u32 2147483647, %v929_v40 }
0x10b0   :  { %1838 = vrcp.f32 %v930_v41  ;;  %v1298_v34 = vmul.f32 %v1831_v33, %v1297_v42  ;;  %v957_v21 = vand.u32 2147483648, %v930_v41  ;;  %vm951_vm11 = vweird.f32 %v930_v41 }
0x10b1   :  { %v955_v9 = vand.u32 2147483647, %v930_v41  ;;  %v943_v12 = vor.u32 1.1754944e-38, %v942_v1  ;;  %vm941_vm4 = vcmp.eq.f32.partialorder %v940_v22, 8.507059e+37 }
0x10b2   :  { %v1299_v43 = vadd.f32 %v1831_v33, %v1298_v34  ;;  %v958_v13 = vor.u32 1.1754944e-38, %v957_v21 }
0x10b3   :  { %vm956_vm5 = vcmp.eq.f32.partialorder %v955_v9, 8.507059e+37 }
0x10b4   :  { %v1303_v50 = vsel %vm1302_vm15, %v1831_v33, %v1299_v43 }
0x10b5   :  { %v1837_v44 = vpop.eup %1836  ;;  %v1308_v48 = vsel %vm1305_vm0, %v1307_v52, %v1303_v50 }
0x10b6   :  { %v1839_v46 = vpop.eup %1838  ;;  %v932_v51 = vmul.f32 %v1837_v44, %v929_v40  ;;  %vm937_vm12 = vweird.f32 %v1837_v44  ;;  %v1314_v24 = vmul.f32 %v1312_v20, %v1308_v48 }
0x10b7   :  { %v947_v54 = vmul.f32 %v1839_v46, %v930_v41  ;;  %vm952_vm13 = vweird.f32 %v1839_v46  ;;  %vm938_vm1 = vmor %vm936_vm8, %vm937_vm12 }
0x10b8   :  { %v933_v27 = vsub.f32 1.0, %v932_v51  ;;  %vm953_vm2 = vmor %vm951_vm11, %vm952_vm13 }
0x10b9   :  { %v948_v35 = vsub.f32 1.0, %v947_v54 }
0x10ba   :  { %v934_v60 = vmul.f32 %v1837_v44, %v933_v27 }
0x10bb   :  { %v949_v61 = vmul.f32 %v1839_v46, %v948_v35 }
0x10bc   :  { %v935_v62 = vadd.f32 %v1837_v44, %v934_v60 }
0x10bd   :  { %v950_v0 = vadd.f32 %v1839_v46, %v949_v61 }
0x10be   :  { %v939_v10 = vsel %vm938_vm1, %v1837_v44, %v935_v62 }
0x10bf   :  { %v954_v11 = vsel %vm953_vm2, %v1839_v46, %v950_v0  ;;  %v944_v15 = vsel %vm941_vm4, %v943_v12, %v939_v10 }
0x10c0   :  { %v959_v17 = vsel %vm956_vm5, %v958_v13, %v954_v11  ;;  %v969_v57 = vmul.f32 %v965_v26, %v944_v15 }
0x10c1   :  { %v970_v29 = vmul.f32 %v966_v47, %v959_v17 }
0x10fb   :  { %v1317_v55 = vpop.permute.xlu2 %1316 }
0x10fc   :  { %v1319_v59 = vmul.f32 %v1317_v55, %v1308_v48 }
0x10fe   :  { %1321 = vrot.lane.b32.xlu2 %v1319_v59, %s2012_s13 }
0x110b   :  { %v974_v14 = vpop.permute.xlu0 %973 }
0x110c   :  { %v976_v16 = vpop.permute.xlu1 %975  ;;  %v979_v18 = vmul.f32 %v974_v14, %v944_v15 }
0x110d   :  { %v980_v19 = vmul.f32 %v976_v16, %v959_v17 }
0x110e   :  { %983 = vrot.lane.b32.xlu0 %v979_v18, %s2012_s13 }
0x110f   :  { %985 = vrot.lane.b32.xlu1 %v980_v19, %s2012_s13 }
0x1158   :  { %v1322_v25 = vpop.permute.xlu2 %1321 }
0x1159   :  { %v2308_v2 = vadd.f32 %v1322_v25, %v1314_v24 }
0x115b   :  { %1840 = vtanh.f32 %v2308_v2  ;;  %v1379_v61 = vrot.slane %v2308_v2, 6 }
0x1161   :  { %v1841_v39 = vpop.eup %1840 }
0x1162   :  { %1327 = vrot.lane.b32.xlu2 %v1841_v39, %s2012_s13 }
0x1180   :  { %v984_v3 = vpop.permute.xlu0 %983 }
0x1181   :  { %v986_v30 = vpop.permute.xlu1 %985  ;;  %v989_v4 = vadd.f32 %v984_v3, %v969_v57 }
0x1182   :  { %v990_v5 = vadd.f32 %v986_v30, %v970_v29 }
0x1183   :  { %1842 = vtanh.f32 %v989_v4 }
0x1184   :  { %1844 = vtanh.f32 %v990_v5 }
0x1189   :  { %v1843_v56 = vpop.eup %1842 }
0x118a   :  { %v1845_v6 = vpop.eup %1844  ;;  %995 = vrot.lane.b32.xlu0 %v1843_v56, %s2012_s13 }
0x118b   :  { %997 = vrot.lane.b32.xlu1 %v1845_v6, %s2012_s13 }
0x11bc   :  { %v1328_v31 = vpop.permute.xlu2 %1327 }
0x11bd   :  { %v1330_v8 = vmul.f32 %v1328_v31, %v1308_v48 }
0x11bf   :  { %v1332_v7 = vrot.slane %v1330_v8, 6 }
0x11c1   :  { %1333 = vrot.lane.b32.xlu2 %v1332_v7, %s2013_s14 }
0x11fc   :  { %v996_v63 = vpop.permute.xlu0 %995 }
0x11fd   :  { %v998_v28 = vpop.permute.xlu1 %997  ;;  %v1001_v36 = vmul.f32 %v996_v63, %v944_v15 }
0x11fe   :  { %v1002_v32 = vmul.f32 %v998_v28, %v959_v17 }
0x11ff   :  { %v1030_v33 = vrot.slane %v1001_v36, 1 }
0x1201   :  { %v1031_v58 = vsel %vm2361_vm6, %v1002_v32, %v1030_v33 }
0x1202   :  { %v1041_v37 = vsel %vm2362_vm7, %v2290_v23, %v1031_v58 }
0x1203   :  { %1055 = vrot.lane.b32.xlu0 %v1041_v37, %s2013_s14 }
0x121b   :  { %v1334_v38 = vpop.permute.xlu2 %1333 }
0x121c   :  { %1667 = vmatmul.msk.f32.vlgmr.msrb.gmra.mxu2 %vm195_vm10, %v1334_v38 }
0x1275   :  { %v1056_v40 = vpop.permute.xlu0 %1055 }
0x1276   :  { %1659 = vmatmul.msk.f32.gmra.mxu1 %vm195_vm10, %v1056_v40 }
0x129f   :  { %v1354_v34 = vpop.f32.mrf.mxu2 }
0x12f3   :  { %v1081_v41 = vpop.f32.mrf.mxu1 }
0x12f4   :  { %v2324_v42 = vadd.f32 %v2159_v53, %v1081_v41 }
0x12f6   :  { %v1357_v43 = vadd.f32 %v1354_v34, %v2324_v42 }
0x12f8   :  { %1846 = vtanh.f32 %v1357_v43  ;;  %v1668_v23 = vmul.f32 -1.442695, %v1357_v43 }
0x12fa   :  { %1848 = vpow2.f32 %v1668_v23 }
0x12fe   :  { %v1847_v44 = vpop.eup %1846 }
0x12ff   :  { %1383 = vrot.lane.b32.xlu1 %v1847_v44, %s2012_s13 }
0x1300   :  { %v1849_v45 = vpop.eup %1848 }
0x1301   :  { %v1361_v46 = vadd.f32 1.0, %v1849_v45 }
0x1303   :  { %1850 = vrcp.f32 %v1361_v46  ;;  %v1373_v53 = vand.u32 2147483648, %v1361_v46  ;;  %vm1367_vm9 = vweird.f32 %v1361_v46  ;;  %v1371_v55 = vand.u32 2147483647, %v1361_v46 }
0x1305   :  { %v1374_v59 = vor.u32 1.1754944e-38, %v1373_v53  ;;  %vm1372_vm15 = vcmp.eq.f32.partialorder %v1371_v55, 8.507059e+37 }
0x1309   :  { %v1851_v49 = vpop.eup %1850 }
0x130a   :  { %v1363_v50 = vmul.f32 %v1851_v49, %v1361_v46  ;;  %vm1368_vm3 = vweird.f32 %v1851_v49 }
0x130b   :  { %vm1369_vm14 = vmor %vm1367_vm9, %vm1368_vm3  ;;  %vm1611_vm3 = vcmask 261126  }
0x130c   :  { %v1364_v51 = vsub.f32 1.0, %v1363_v50 }
0x130e   :  { %v1365_v52 = vmul.f32 %v1851_v49, %v1364_v51 }
0x1310   :  { %v1366_v54 = vadd.f32 %v1851_v49, %v1365_v52 }
0x1312   :  { %v1370_v48 = vsel %vm1369_vm14, %v1851_v49, %v1366_v54 }
0x1313   :  { %v1375_v35 = vsel %vm1372_vm15, %v1374_v59, %v1370_v48 }
0x1314   :  { %v1381_v62 = vmul.f32 %v1379_v61, %v1375_v35 }
0x1371   :  { %v1384_v27 = vpop.permute.xlu1 %1383 }
0x1372   :  { %v1386_v60 = vmul.f32 %v1384_v27, %v1375_v35 }
0x1374   :  { %1388 = vrot.lane.b32.xlu2 %v1386_v60, %s2012_s13 }
0x13ce   :  { %v1389_v0 = vpop.permute.xlu2 %1388 }
0x13cf   :  { %v1391_v1 = vadd.f32 %v1389_v0, %v1381_v62 }
0x13d1   :  { %1852 = vtanh.f32 %v1391_v1  ;;  %v1448_v30 = vrot.slane %v1391_v1, 6 }
0x13d7   :  { %v1853_v21 = vpop.eup %1852 }
0x13d8   :  { %1394 = vrot.lane.b32.xlu0 %v1853_v21, %s2012_s13 }
0x144a   :  { %v1395_v22 = vpop.permute.xlu0 %1394 }
0x144b   :  { %v1397_v9 = vmul.f32 %v1395_v22, %v1375_v35 }
0x144d   :  { %1399 = vrot.lane.b32.xlu1 %v1397_v9, %s2013_s14 }
0x14bf   :  { %v1400_v10 = vpop.permute.xlu1 %1399 }
0x14c0   :  { %1669 = vmatmul.msk.f32.vlgmr.msrb.gmra.mxu3 %vm195_vm10, %v1400_v10 }
0x1543   :  { %v1420_v11 = vpop.f32.mrf.mxu3 }
0x1544   :  { %v1424_v12 = vrot.slane %v1420_v11, 6 }
0x1546   :  { %v1426_v13 = vadd.f32 %v1424_v12, %v2324_v42 }
0x1548   :  { %1854 = vtanh.f32 %v1426_v13  ;;  %v1670_v15 = vmul.f32 -1.442695, %v1426_v13 }
0x154a   :  { %1856 = vpow2.f32 %v1670_v15 }
0x154e   :  { %v1855_v14 = vpop.eup %1854 }
0x154f   :  { %1452 = vrot.lane.b32.xlu2 %v1855_v14, %s2012_s13 }
0x1550   :  { %v1857_v16 = vpop.eup %1856 }
0x1551   :  { %v1430_v17 = vadd.f32 1.0, %v1857_v16 }
0x1553   :  { %1858 = vrcp.f32 %v1430_v17  ;;  %v1442_v2 = vand.u32 2147483648, %v1430_v17  ;;  %vm1436_vm12 = vweird.f32 %v1430_v17  ;;  %v1440_v39 = vand.u32 2147483647, %v1430_v17 }
0x1555   :  { %v1443_v47 = vor.u32 1.1754944e-38, %v1442_v2  ;;  %vm1441_vm8 = vcmp.eq.f32.partialorder %v1440_v39, 8.507059e+37 }
0x1559   :  { %v1859_v18 = vpop.eup %1858 }
0x155a   :  { %v1432_v19 = vmul.f32 %v1859_v18, %v1430_v17  ;;  %vm1437_vm0 = vweird.f32 %v1859_v18 }
0x155b   :  { %vm1438_vm13 = vmor %vm1436_vm12, %vm1437_vm0 }
0x155c   :  { %v1433_v20 = vsub.f32 1.0, %v1432_v19 }
0x155e   :  { %v1434_v24 = vmul.f32 %v1859_v18, %v1433_v20 }
0x1560   :  { %v1435_v25 = vadd.f32 %v1859_v18, %v1434_v24 }
0x1562   :  { %v1439_v26 = vsel %vm1438_vm13, %v1859_v18, %v1435_v25 }
0x1563   :  { %v1444_v29 = vsel %vm1441_vm8, %v1443_v47, %v1439_v26 }
0x1564   :  { %v1450_v4 = vmul.f32 %v1448_v30, %v1444_v29 }
0x15a9   :  { %v1453_v57 = vpop.permute.xlu2 %1452 }
0x15aa   :  { %v1455_v3 = vmul.f32 %v1453_v57, %v1444_v29 }
0x15ac   :  { %1457 = vrot.lane.b32.xlu0 %v1455_v3, %s2012_s13 }
0x161e   :  { %v1458_v5 = vpop.permute.xlu0 %1457 }
0x161f   :  { %v1460_v56 = vadd.f32 %v1458_v5, %v1450_v4 }
0x1621   :  { %1860 = vtanh.f32 %v1460_v56  ;;  %v1518_v54 = vrot.slane %v1460_v56, 6 }
0x1627   :  { %v1861_v6 = vpop.eup %1860 }
0x1628   :  { %1463 = vrot.lane.b32.xlu1 %v1861_v6, %s2012_s13 }
0x169a   :  { %v1464_v31 = vpop.permute.xlu1 %1463 }
0x169b   :  { %v1466_v8 = vmul.f32 %v1464_v31, %v1444_v29 }
0x169d   :  { %v1468_v7 = vrot.slane %v1466_v8, 2 }
0x169f   :  { %1469 = vrot.lane.b32.xlu2 %v1468_v7, %s2013_s14 }
0x16f9   :  { %v1470_v63 = vpop.permute.xlu2 %1469 }
0x16fa   :  { %1671 = vmatmul.msk.f32.vlgmr.msrb.gmra.mxu0 %vm195_vm10, %v1470_v63 }
0x1777   :  { %v1490_v28 = vpop.f32.mrf.mxu0 }
0x1778   :  { %v1494_v36 = vrot.slane %v1490_v28, 4 }
0x177a   :  { %v1496_v32 = vadd.f32 %v1494_v36, %v2324_v42 }
0x177c   :  { %1862 = vtanh.f32 %v1496_v32  ;;  %v1672_v58 = vmul.f32 -1.442695, %v1496_v32 }
0x177e   :  { %1864 = vpow2.f32 %v1672_v58 }
0x1782   :  { %v1863_v33 = vpop.eup %1862 }
0x1783   :  { %1522 = vrot.lane.b32.xlu0 %v1863_v33, %s2012_s13 }
0x1784   :  { %v1865_v37 = vpop.eup %1864 }
0x1785   :  { %v1500_v38 = vadd.f32 1.0, %v1865_v37 }
0x1787   :  { %1866 = vrcp.f32 %v1500_v38  ;;  %v1512_v23 = vand.u32 2147483648, %v1500_v38  ;;  %vm1506_vm1 = vweird.f32 %v1500_v38  ;;  %v1510_v45 = vand.u32 2147483647, %v1500_v38 }
0x1789   :  { %v1513_v49 = vor.u32 1.1754944e-38, %v1512_v23  ;;  %vm1511_vm4 = vcmp.eq.f32.partialorder %v1510_v45, 8.507059e+37 }
0x178d   :  { %v1867_v40 = vpop.eup %1866 }
0x178e   :  { %v1502_v41 = vmul.f32 %v1867_v40, %v1500_v38  ;;  %vm1507_vm11 = vweird.f32 %v1867_v40 }
0x178f   :  { %vm1508_vm2 = vmor %vm1506_vm1, %vm1507_vm11 }
0x1790   :  { %v1503_v34 = vsub.f32 1.0, %v1502_v41 }
0x1792   :  { %v1504_v43 = vmul.f32 %v1867_v40, %v1503_v34 }
0x1794   :  { %v1505_v44 = vadd.f32 %v1867_v40, %v1504_v43 }
0x1796   :  { %v1509_v46 = vsel %vm1508_vm2, %v1867_v40, %v1505_v44 }
0x1797   :  { %v1514_v51 = vsel %vm1511_vm4, %v1513_v49, %v1509_v46 }
0x1798   :  { %v1520_v53 = vmul.f32 %v1518_v54, %v1514_v51 }
0x17f5   :  { %v1523_v50 = vpop.permute.xlu0 %1522 }
0x17f6   :  { %v1525_v52 = vmul.f32 %v1523_v50, %v1514_v51 }
0x17f8   :  { %1527 = vrot.lane.b32.xlu1 %v1525_v52, %s2012_s13 }
0x186a   :  { %v1528_v55 = vpop.permute.xlu1 %1527 }
0x186b   :  { %v1530_v48 = vadd.f32 %v1528_v55, %v1520_v53 }
0x186d   :  { %1868 = vtanh.f32 %v1530_v48  ;;  %v1588_v25 = vrot.slane %v1530_v48, 6 }
0x1873   :  { %v1869_v59 = vpop.eup %1868 }
0x1874   :  { %1533 = vrot.lane.b32.xlu2 %v1869_v59, %s2012_s13 }
0x18ce   :  { %v1534_v27 = vpop.permute.xlu2 %1533 }
0x18cf   :  { %v1536_v35 = vmul.f32 %v1534_v27, %v1514_v51 }
0x18d1   :  { %v1538_v60 = vrot.slane %v1536_v35, 4 }
0x18d3   :  { %1539 = vrot.lane.b32.xlu0 %v1538_v60, %s2013_s14 }
0x1945   :  { %v1540_v61 = vpop.permute.xlu0 %1539 }
0x1946   :  { %1673 = vmatmul.msk.f32.vlgmr.msrb.gmra.mxu1 %vm195_vm10, %v1540_v61 }
0x19c3   :  { %v1560_v62 = vpop.f32.mrf.mxu1 }
0x19c4   :  { %v1564_v0 = vrot.slane %v1560_v62, 2 }
0x19c6   :  { %v1566_v1 = vadd.f32 %v1564_v0, %v2324_v42 }
0x19c8   :  { %1870 = vtanh.f32 %v1566_v1  ;;  %v1674_v22 = vmul.f32 -1.442695, %v1566_v1 }
0x19ca   :  { %1872 = vpow2.f32 %v1674_v22 }
0x19ce   :  { %v1871_v21 = vpop.eup %1870 }
0x19cf   :  { %1592 = vrot.lane.b32.xlu1 %v1871_v21, %s2012_s13 }
0x19d0   :  { %v1873_v9 = vpop.eup %1872 }
0x19d1   :  { %v1570_v10 = vadd.f32 1.0, %v1873_v9 }
0x19d3   :  { %1874 = vrcp.f32 %v1570_v10  ;;  %v1582_v16 = vand.u32 2147483648, %v1570_v10  ;;  %vm1576_vm10 = vweird.f32 %v1570_v10  ;;  %v1580_v17 = vand.u32 2147483647, %v1570_v10 }
0x19d5   :  { %v1583_v18 = vor.u32 1.1754944e-38, %v1582_v16  ;;  %vm1581_vm7 = vcmp.eq.f32.partialorder %v1580_v17, 8.507059e+37 }
0x19d9   :  { %v1875_v11 = vpop.eup %1874 }
0x19da   :  { %v1572_v12 = vmul.f32 %v1875_v11, %v1570_v10  ;;  %vm1577_vm5 = vweird.f32 %v1875_v11 }
0x19db   :  { %vm1578_vm6 = vmor %vm1576_vm10, %vm1577_vm5 }
0x19dc   :  { %v1573_v13 = vsub.f32 1.0, %v1572_v12 }
0x19de   :  { %v1574_v14 = vmul.f32 %v1875_v11, %v1573_v13 }
0x19e0   :  { %v1575_v15 = vadd.f32 %v1875_v11, %v1574_v14 }
0x19e2   :  { %v1579_v42 = vsel %vm1578_vm6, %v1875_v11, %v1575_v15 }
0x19e3   :  { %v1584_v20 = vsel %vm1581_vm7, %v1583_v18, %v1579_v42 }
0x19e4   :  { %v1590_v2 = vmul.f32 %v1588_v25, %v1584_v20 }
0x1a41   :  { %v1593_v19 = vpop.permute.xlu1 %1592 }
0x1a42   :  { %v1595_v24 = vmul.f32 %v1593_v19, %v1584_v20 }
0x1a44   :  { %1597 = vrot.lane.b32.xlu2 %v1595_v24, %s2012_s13 }
0x1a9e   :  { %v1598_v39 = vpop.permute.xlu2 %1597 }
0x1a9f   :  { %v1600_v26 = vadd.f32 %v1598_v39, %v1590_v2 }
0x1aa1   :  { %1876 = vtanh.f32 %v1600_v26 }
0x1aa7   :  { %v1877_v47 = vpop.eup %1876 }
0x1aa8   :  { %1603 = vrot.lane.b32.xlu0 %v1877_v47, %s2012_s13 }
0x1b1a   :  { %v1604_v57 = vpop.permute.xlu0 %1603 }
0x1b1b   :  { %v1606_v29 = vmul.f32 %v1604_v57, %v1584_v20 }
0x1b1d   :  { %1608 = vrot.lane.b32.xlu1 %v1606_v29, %s2013_s14 }
0x1b8f   :  { %v1609_v3 = vpop.permute.xlu1 %1608 }
0x1b90   :  { %1612 = vst.msk [vmem:[#allocation10 - $0x6] sm:$0xc0] %vm1611_vm3, %v1609_v3 }
0x1b91   :  { %1623 = dma.vmem_to_hbm [thread:$0]  %s1619_s17, 32, %s1621_s20, [#allocation4]  }
0x1b92   :  { %2004 = dma.done.wait [#allocation4], 32  }
0x1b93   :  { %2005 = vsyncadd [#allocation4], 4294967264 }
0x1b94   :  { %1628 = vsyncpa [#allocation3], 1 }
0x1b95   :  { %1629 = vsyncpa [#allocation6], 1 }
0x1b96   :  { %1630 = vsyncpa [#allocation9], 1 }
0x1b97   :  { %1631 = vsyncpa [#allocation4], 1 }

</bundles_post_ra>
